<compile_context>
chip_gen: v6e
topology: v6e:2x2x1
jax: 0.10.0
libtpu: 0.0.40
codegen_flags: <defaults>
</compile_context>

<pallas_src>
import math
from functools import partial

import jax
import jax.numpy as jnp
from jax.experimental import pallas as pl
from jax.experimental.pallas import tpu as pltpu

# ----------------------------------------------------------------------------
# Model configuration (consistent with the module's __init__; spatial is the
# hardcoded 32x32 from `in_features=32*32*n_channels`)
# ----------------------------------------------------------------------------
HIN = 8          # hyper input size
DIMENSIONS = 4   # number of mixed parameter sets
N_LAYERS = 3     # -> 2 hidden (batch-normed) layers between fc1 and fc2
N_UNITS = 64
N_CHANNELS = 3
N_CLASSES = 10
BATCH = 8
D_IN = 32 * 32 * N_CHANNELS
BN_EPS = 1e-5

OUT_PAD = 128    # pad each per-dim fc2 class chunk to a full lane group
K_TILE = 1536    # fc1 reduction tile (grid axis) -> nk=2, pipelines the fc1 DMA


# ----------------------------------------------------------------------------
# Fused kernel: hyper stack (k==0) + fc1 (K-tiled) + hidden BN layers + fc2
# ----------------------------------------------------------------------------
def _fused_kernel(*refs, n_mid):
    (hx_ref, hw1_ref, hb1_ref, hw2_ref, hb2_ref,
     x_ref, wfc1_ref, bfc1_ref, *rest) = refs
    mid_refs = rest[:2 * n_mid]
    wfc2_ref, bfc2_ref, o_ref, acc_ref, f_sc, b_sc = rest[2 * n_mid:]

    k = pl.program_id(0)

    # ---- k == 0: zero the accumulator, run the hyper stack, precompute the
    #      mixing factors + mixed biases; all of this hides under the fc1 weight
    #      DMAs of tiles 1..nk-1.
    @pl.when(k == 0)
    def _init():
        acc_ref[...] = jnp.zeros_like(acc_ref)

        # hyper stack: Linear(hin,64) -> ReLU -> Linear(64,dims) -> Softmax
        h = jnp.dot(hx_ref[...], hw1_ref[...],
                    preferred_element_type=jnp.float32) + hb1_ref[...]
        h = jnp.maximum(h, 0.0)
        z = jnp.dot(h, hw2_ref[...],
                    preferred_element_type=jnp.float32) + hb2_ref[...]
        z = z - jnp.max(z, axis=-1, keepdims=True)
        e = jnp.exp(z)
        f = e / jnp.sum(e, axis=-1, keepdims=True)            # (1, DIMS)
        f_sc[...] = f

        # mixed biases on the VPU (broadcast-mul-add, no MXU push/pop)
        def mix_bias(bref):
            acc = f[:, 0:1] * bref[0:1, :]
            for d in range(1, DIMENSIONS):
                acc = acc + f[:, d:d + 1] * bref[d:d + 1, :]
            return acc                                         # (1, out)

        b_sc[0:1, 0:N_UNITS] = mix_bias(bfc1_ref)
        for li in range(n_mid):
            b_sc[li + 1:li + 2, 0:N_UNITS] = mix_bias(mid_refs[2 * li + 1])
        b_sc[n_mid + 1:n_mid + 2, :] = mix_bias(bfc2_ref)

    # ---- fc1 partial matmul for this K tile: (B, TK) @ (TK, DIMS*N_UNITS)
    #      weights are bf16 in HBM; cast x to bf16 here, accumulate in f32.
    acc_ref[...] += jnp.dot(x_ref[...].astype(jnp.bfloat16), wfc1_ref[...],
                            preferred_element_type=jnp.float32)

    # ---- last K tile: mix fc1 outputs, run hidden BN layers and fc2
    @pl.when(k == pl.num_programs(0) - 1)
    def _finalize():
        f = f_sc[...]                                          # (1, DIMS)

        def mix(chunks):
            # sum_d f_d * chunk_d   (chunks: list of (B, n) arrays)
            y = f[:, 0:1] * chunks[0]
            for d in range(1, DIMENSIONS):
                y = y + f[:, d:d + 1] * chunks[d]
            return y

        # fc1: mix per-dim partial outputs + precomputed mixed bias, ReLU
        y = mix([acc_ref[:, d * N_UNITS:(d + 1) * N_UNITS]
                 for d in range(DIMENSIONS)]) + b_sc[0:1, 0:N_UNITS]
        y = jnp.maximum(y, 0.0)

        # hidden layers: mixed linear + batch-norm (batch stats) + ReLU
        for li in range(n_mid):
            wm_ref = mid_refs[2 * li]
            t = jnp.dot(y, wm_ref[...], preferred_element_type=jnp.float32)
            t = mix([t[:, d * N_UNITS:(d + 1) * N_UNITS]
                     for d in range(DIMENSIONS)]) + b_sc[li + 1:li + 2, 0:N_UNITS]
            mu = jnp.mean(t, axis=0, keepdims=True)
            var = jnp.mean((t - mu) ** 2, axis=0, keepdims=True)
            t = (t - mu) * jax.lax.rsqrt(var + BN_EPS)
            y = jnp.maximum(t, 0.0)

        # fc2: per-dim class chunks are zero-padded to OUT_PAD lanes so the mix
        # slices are vreg-aligned and the final store is lane-dense.
        t = jnp.dot(y, wfc2_ref[...], preferred_element_type=jnp.float32)
        o_ref[...] = mix([t[:, d * OUT_PAD:(d + 1) * OUT_PAD]
                          for d in range(DIMENSIONS)]) + b_sc[n_mid + 1:n_mid + 2, :]


# ----------------------------------------------------------------------------
# Wrapper
# ----------------------------------------------------------------------------
@jax.jit
def hhn_mlpb_forward(kp, x, hyper_x):
    b = x.shape[0]
    xf = x.reshape(b, -1).astype(jnp.float32)       # torch.flatten(x, start_dim=1)
    d_in = kp["w_fc1"].shape[0]
    n_mid = len(kp["w_mid"])
    tk = K_TILE if d_in % K_TILE == 0 else d_in
    nk = d_in // tk

    inputs = [hyper_x.reshape(1, -1).astype(jnp.float32),
              kp["hw1"], kp["hb1"], kp["hw2"], kp["hb2"],
              xf, kp["w_fc1"], kp["b_fc1"]]
    in_specs = [
        pl.BlockSpec((1, HIN), lambda k: (0, 0)),
        pl.BlockSpec((HIN, 64), lambda k: (0, 0)),
        pl.BlockSpec((1, 64), lambda k: (0, 0)),
        pl.BlockSpec((64, DIMENSIONS), lambda k: (0, 0)),
        pl.BlockSpec((1, DIMENSIONS), lambda k: (0, 0)),
        pl.BlockSpec((b, tk), lambda k: (0, k)),
        pl.BlockSpec((tk, DIMENSIONS * N_UNITS), lambda k: (k, 0)),
        pl.BlockSpec((DIMENSIONS, N_UNITS), lambda k: (0, 0)),
    ]
    for wm, bm in zip(kp["w_mid"], kp["b_mid"]):
        inputs += [wm, bm]
        in_specs += [
            pl.BlockSpec((N_UNITS, DIMENSIONS * N_UNITS), lambda k: (0, 0)),
            pl.BlockSpec((DIMENSIONS, N_UNITS), lambda k: (0, 0)),
        ]
    inputs += [kp["w_fc2"], kp["b_fc2"]]
    in_specs += [
        pl.BlockSpec((N_UNITS, DIMENSIONS * OUT_PAD), lambda k: (0, 0)),
        pl.BlockSpec((DIMENSIONS, OUT_PAD), lambda k: (0, 0)),
    ]

    out_padded = pl.pallas_call(
        partial(_fused_kernel, n_mid=n_mid),
        out_shape=jax.ShapeDtypeStruct((b, OUT_PAD), jnp.float32),
        grid=(nk,),
        in_specs=in_specs,
        out_specs=pl.BlockSpec((b, OUT_PAD), lambda k: (0, 0)),
        scratch_shapes=[
            pltpu.VMEM((b, DIMENSIONS * N_UNITS), jnp.float32),   # fc1 accumulator
            pltpu.VMEM((1, DIMENSIONS), jnp.float32),              # softmax factors
            pltpu.VMEM((n_mid + 2, OUT_PAD), jnp.float32),         # mixed biases
        ],
        compiler_params=pltpu.CompilerParams(
            dimension_semantics=("arbitrary",)),   # K reduction; single TC is fine
    )(*inputs)
    return out_padded[:, :N_CLASSES]
    # TODO(synk): F.batch_norm's running_mu/running_std in-place update is a
    # training-only side effect that does not influence the output (training=True),
    # so it is intentionally not reproduced.
    # TODO(synk): if this forward is called repeatedly with fixed weights, prefetch
    # the bf16 w_fc1 HBM->VMEM in a prior pallas_call (P10 cross-call future) so the
    # kernel becomes launch-overhead bound.


# ----------------------------------------------------------------------------
# Deterministic parameter construction (PyTorch default Linear init scheme)
# ----------------------------------------------------------------------------
def _init_linear(key, out_f, in_f):
    kw, kb = jax.random.split(key)
    bound = 1.0 / math.sqrt(in_f)   # kaiming_uniform(a=sqrt(5)) bound == 1/sqrt(fan_in)
    w = jax.random.uniform(kw, (out_f, in_f), jnp.float32, -bound, bound)
    b = jax.random.uniform(kb, (out_f,), jnp.float32, -bound, bound)
    return w, b


def _init_stacked(key, dims, out_f, in_f):
    ws, bs = [], []
    for kk in jax.random.split(key, dims):
        w, b = _init_linear(kk, out_f, in_f)
        ws.append(w)
        bs.append(b)
    return jnp.stack(ws), jnp.stack(bs)            # (dims,out,in), (dims,out)


def init_params(key):
    k = jax.random.split(key, 5)
    hyper_w1, hyper_b1 = _init_linear(k[0], 64, HIN)
    hyper_w2, hyper_b2 = _init_linear(k[1], DIMENSIONS, 64)
    w_fc1, b_fc1 = _init_stacked(k[2], DIMENSIONS, N_UNITS, D_IN)
    w_mid, b_mid = [], []
    for kk in jax.random.split(k[3], N_LAYERS - 1):
        w, b = _init_stacked(kk, DIMENSIONS, N_UNITS, N_UNITS)
        w_mid.append(w)
        b_mid.append(b)
    w_fc2, b_fc2 = _init_stacked(k[4], DIMENSIONS, N_CLASSES, N_UNITS)
    return dict(hyper_w1=hyper_w1, hyper_b1=hyper_b1,
                hyper_w2=hyper_w2, hyper_b2=hyper_b2,
                w_fc1=w_fc1, b_fc1=b_fc1,
                w_mid=w_mid, b_mid=b_mid,
                w_fc2=w_fc2, b_fc2=b_fc2)


def pack_params(params):
    """Repack PyTorch-layout params into the kernel's lane-dense layout (once).

    The fc1 weight stack is stored bf16 (it is the dominant, DMA-bound stream);
    all other weights stay f32 (negligible bytes, minimal numeric drift)."""
    def pack_stack(w_stack, b_stack, out_pad=None):
        dims, out_f, in_f = w_stack.shape
        wt = jnp.transpose(w_stack, (2, 0, 1))     # (in, dims, out): wt[i,d,o]=W_d[o,i]
        bs = b_stack
        if out_pad is not None and out_pad != out_f:
            wt = jnp.pad(wt, ((0, 0), (0, 0), (0, out_pad - out_f)))
            bs = jnp.pad(b_stack, ((0, 0), (0, out_pad - out_f)))
            out_f = out_pad
        return wt.reshape(in_f, dims * out_f), bs

    w_fc1, b_fc1 = pack_stack(params["w_fc1"], params["b_fc1"])
    w_fc1 = w_fc1.astype(jnp.bfloat16)             # halve the dominant HBM stream
    w_mid, b_mid = [], []
    for w, b in zip(params["w_mid"], params["b_mid"]):
        wp, bp = pack_stack(w, b)
        w_mid.append(wp)
        b_mid.append(bp)
    w_fc2, b_fc2 = pack_stack(params["w_fc2"], params["b_fc2"], out_pad=OUT_PAD)
    return dict(
        hw1=params["hyper_w1"].T,                  # (HIN, 64)
        hb1=params["hyper_b1"].reshape(1, -1),     # (1, 64)
        hw2=params["hyper_w2"].T,                  # (64, DIMS)
        hb2=params["hyper_b2"].reshape(1, -1),     # (1, DIMS)
        w_fc1=w_fc1, b_fc1=b_fc1,                  # (D_IN, DIMS*64) bf16, (DIMS, 64)
        w_mid=w_mid, b_mid=b_mid,                  # (64, DIMS*64),   (DIMS, 64)
        w_fc2=w_fc2, b_fc2=b_fc2)                  # (64, DIMS*128),  (DIMS, 128)


# ----------------------------------------------------------------------------
# Pure-JAX reference (mirrors the PyTorch forward) for a sanity check
# ----------------------------------------------------------------------------
_HI = jax.lax.Precision.HIGHEST


def reference_forward(params, x, hyper_x):
    h = jnp.maximum(jnp.dot(hyper_x, params["hyper_w1"].T, precision=_HI)
                    + params["hyper_b1"], 0.0)
    z = jnp.dot(h, params["hyper_w2"].T, precision=_HI) + params["hyper_b2"]
    f = jax.nn.softmax(z, axis=0)

    def mix(ws, bs):
        return (jnp.einsum("d,doi->oi", f, ws, precision=_HI),
                jnp.einsum("d,do->o", f, bs, precision=_HI))

    w1, b1 = mix(params["w_fc1"], params["b_fc1"])
    logits = jnp.dot(x.reshape(x.shape[0], -1), w1.T, precision=_HI) + b1
    logits = jnp.maximum(logits, 0.0)
    for ws, bs in zip(params["w_mid"], params["b_mid"]):
        w, b = mix(ws, bs)
        logits = jnp.dot(logits, w.T, precision=_HI) + b
        mu = jnp.mean(logits, axis=0, keepdims=True)
        var = jnp.mean((logits - mu) ** 2, axis=0, keepdims=True)
        logits = (logits - mu) / jnp.sqrt(var + BN_EPS)
        logits = jnp.maximum(logits, 0.0)
    w2, b2 = mix(params["w_fc2"], params["b_fc2"])
    return jnp.dot(logits, w2.T, precision=_HI) + b2


# ----------------------------------------------------------------------------
if __name__ == "__main__":
    root = jax.random.PRNGKey(0)
    k_params, k_x, k_h = jax.random.split(root, 3)

    params = init_params(k_params)
    kparams = pack_params(params)
    x = jax.random.normal(k_x, (BATCH, N_CHANNELS, 32, 32), jnp.float32)
    hyper_x = jax.random.normal(k_h, (HIN,), jnp.float32)

    out = jax.block_until_ready(hhn_mlpb_forward(kparams, x, hyper_x))
    assert out.shape == (BATCH, N_CLASSES), out.shape

    # 1) Tight structural check against a reference that mirrors the kernel's
    #    bf16 quantization of (x, w_fc1); everything else f32.
    params_q = dict(params)
    params_q["w_fc1"] = params["w_fc1"].astype(jnp.bfloat16).astype(jnp.float32)
    x_q = x.astype(jnp.bfloat16).astype(jnp.float32)
    ref_q = reference_forward(params_q, x_q, hyper_x)
    err_q = float(jnp.max(jnp.abs(out - ref_q)))
    assert jnp.allclose(out, ref_q, rtol=5e-3, atol=5e-3), err_q

    # 2) Looser fidelity check against the exact f32 PyTorch-semantics reference
    #    (accounts for the deliberate bf16 fc1 weight/input quantization).
    ref = reference_forward(params, x, hyper_x)
    err_f = float(jnp.max(jnp.abs(out - ref)))
    assert jnp.allclose(out, ref, rtol=5e-2, atol=5e-2), err_f

    print("KERNEL_OK")
</pallas_src>

<mosaic_0001>
module attributes {stable_mosaic.version = 11 : i64} {
  func.func @_fused_kernel(%arg0: i32, %arg1: memref<1x8xf32, #tpu.memory_space<vmem>>, %arg2: memref<8x64xf32, #tpu.memory_space<vmem>>, %arg3: memref<1x64xf32, #tpu.memory_space<vmem>>, %arg4: memref<64x4xf32, #tpu.memory_space<vmem>>, %arg5: memref<1x4xf32, #tpu.memory_space<vmem>>, %arg6: memref<8x1536xf32, #tpu.memory_space<vmem>>, %arg7: memref<1536x256xbf16, #tpu.memory_space<vmem>>, %arg8: memref<4x64xf32, #tpu.memory_space<vmem>>, %arg9: memref<64x256xf32, #tpu.memory_space<vmem>>, %arg10: memref<4x64xf32, #tpu.memory_space<vmem>>, %arg11: memref<64x256xf32, #tpu.memory_space<vmem>>, %arg12: memref<4x64xf32, #tpu.memory_space<vmem>>, %arg13: memref<64x512xf32, #tpu.memory_space<vmem>>, %arg14: memref<4x128xf32, #tpu.memory_space<vmem>>, %arg15: memref<8x128xf32, #tpu.memory_space<vmem>>, %arg16: memref<8x256xf32, #tpu.memory_space<vmem>>, %arg17: memref<1x4xf32, #tpu.memory_space<vmem>>, %arg18: memref<4x128xf32, #tpu.memory_space<vmem>>) attributes {dimension_semantics = [#tpu.dimension_semantics<arbitrary>], iteration_bounds = array<i64: 2>, scalar_prefetch = 0 : i64, scratch_operands = 3 : i64, tpu.core_type = #tpu.core_type<tc>, window_params = [{pipeline_mode = #tpu.pipeline_mode<synchronous>, transform_indices = @transform_0, window_bounds = array<i64: 1, 8>}, {pipeline_mode = #tpu.pipeline_mode<synchronous>, transform_indices = @transform_1, window_bounds = array<i64: 8, 64>}, {pipeline_mode = #tpu.pipeline_mode<synchronous>, transform_indices = @transform_2, window_bounds = array<i64: 1, 64>}, {pipeline_mode = #tpu.pipeline_mode<synchronous>, transform_indices = @transform_3, window_bounds = array<i64: 64, 4>}, {pipeline_mode = #tpu.pipeline_mode<synchronous>, transform_indices = @transform_4, window_bounds = array<i64: 1, 4>}, {transform_indices = @transform_5, window_bounds = array<i64: 8, 1536>}, {transform_indices = @transform_6, window_bounds = array<i64: 1536, 256>}, {pipeline_mode = #tpu.pipeline_mode<synchronous>, transform_indices = @transform_7, window_bounds = array<i64: 4, 64>}, {pipeline_mode = #tpu.pipeline_mode<synchronous>, transform_indices = @transform_8, window_bounds = array<i64: 64, 256>}, {pipeline_mode = #tpu.pipeline_mode<synchronous>, transform_indices = @transform_9, window_bounds = array<i64: 4, 64>}, {pipeline_mode = #tpu.pipeline_mode<synchronous>, transform_indices = @transform_10, window_bounds = array<i64: 64, 256>}, {pipeline_mode = #tpu.pipeline_mode<synchronous>, transform_indices = @transform_11, window_bounds = array<i64: 4, 64>}, {pipeline_mode = #tpu.pipeline_mode<synchronous>, transform_indices = @transform_12, window_bounds = array<i64: 64, 512>}, {pipeline_mode = #tpu.pipeline_mode<synchronous>, transform_indices = @transform_13, window_bounds = array<i64: 4, 128>}, {pipeline_mode = #tpu.pipeline_mode<synchronous>, transform_indices = @transform_14, window_bounds = array<i64: 8, 128>}]} {
    %c0_i32 = arith.constant 0 : i32
    %0 = arith.cmpi eq, %arg0, %c0_i32 : i32
    %1 = arith.extui %0 : i1 to i32
    %c0_i32_0 = arith.constant 0 : i32
    %2 = arith.cmpi ne, %1, %c0_i32_0 : i32
    scf.if %2 {
      %cst_9 = arith.constant 0.000000e+00 : f32
      %13 = vector.broadcast %cst_9 : f32 to vector<8x256xf32>
      %c0_10 = arith.constant 0 : index
      %c0_11 = arith.constant 0 : index
      %14 = vector.load %arg16[%c0_10, %c0_11] : memref<8x256xf32, #tpu.memory_space<vmem>>, vector<8x256xf32>
      tpu.vector_store %arg16[%c0_10, %c0_11], %13 {strides = array<i32>} : memref<8x256xf32, #tpu.memory_space<vmem>>, vector<8x256xf32>,
      %c0_12 = arith.constant 0 : index
      %c0_13 = arith.constant 0 : index
      %15 = vector.load %arg1[%c0_12, %c0_13] : memref<1x8xf32, #tpu.memory_space<vmem>>, vector<1x8xf32>
      %c0_14 = arith.constant 0 : index
      %c0_15 = arith.constant 0 : index
      %16 = vector.load %arg2[%c0_14, %c0_15] : memref<8x64xf32, #tpu.memory_space<vmem>>, vector<8x64xf32>
      %cst_16 = arith.constant dense<0.000000e+00> : vector<1x64xf32>
      %17 = tpu.matmul %15, %16, %cst_16 {dimension_numbers = #tpu.dot_dimension_numbers<[1], [0], [0], [1], [0, 0, 1, 1], [], []>} : vector<1x8xf32>, vector<8x64xf32>, vector<1x64xf32> -> vector<1x64xf32>
      %c0_17 = arith.constant 0 : index
      %c0_18 = arith.constant 0 : index
      %18 = vector.load %arg3[%c0_17, %c0_18] : memref<1x64xf32, #tpu.memory_space<vmem>>, vector<1x64xf32>
      %19 = arith.addf %17, %18 : vector<1x64xf32>
      %cst_19 = arith.constant 0.000000e+00 : f32
      %20 = vector.broadcast %cst_19 : f32 to vector<1x64xf32>
      %21 = arith.maximumf %19, %20 : vector<1x64xf32>
      %c0_20 = arith.constant 0 : index
      %c0_21 = arith.constant 0 : index
      %22 = vector.load %arg4[%c0_20, %c0_21] : memref<64x4xf32, #tpu.memory_space<vmem>>, vector<64x4xf32>
      %cst_22 = arith.constant dense<0.000000e+00> : vector<1x4xf32>
      %23 = tpu.matmul %21, %22, %cst_22 {dimension_numbers = #tpu.dot_dimension_numbers<[1], [0], [0], [1], [0, 0, 1, 1], [], []>} : vector<1x64xf32>, vector<64x4xf32>, vector<1x4xf32> -> vector<1x4xf32>
      %c0_23 = arith.constant 0 : index
      %c0_24 = arith.constant 0 : index
      %24 = vector.load %arg5[%c0_23, %c0_24] : memref<1x4xf32, #tpu.memory_space<vmem>>, vector<1x4xf32>
      %25 = arith.addf %23, %24 : vector<1x4xf32>
      %cst_25 = arith.constant dense<0xFF800000> : vector<1xf32>
      %26 = vector.multi_reduction <maximumf>, %25, %cst_25 [1] : vector<1x4xf32> to vector<1xf32>
      %27 = vector.shape_cast %26 : vector<1xf32> to vector<1x1xf32>
      %28 = vector.broadcast %27 : vector<1x1xf32> to vector<1x4xf32>
      %29 = arith.subf %25, %28 : vector<1x4xf32>
      %30 = math.exp %29 : vector<1x4xf32>
      %cst_26 = arith.constant dense<0.000000e+00> : vector<1xf32>
      %31 = vector.multi_reduction <add>, %30, %cst_26 [1] : vector<1x4xf32> to vector<1xf32>
      %32 = vector.shape_cast %31 : vector<1xf32> to vector<1x1xf32>
      %33 = vector.broadcast %32 : vector<1x1xf32> to vector<1x4xf32>
      %34 = arith.divf %30, %33 : vector<1x4xf32>
      %c0_27 = arith.constant 0 : index
      %c0_28 = arith.constant 0 : index
      %35 = vector.load %arg17[%c0_27, %c0_28] : memref<1x4xf32, #tpu.memory_space<vmem>>, vector<1x4xf32>
      tpu.vector_store %arg17[%c0_27, %c0_28], %34 {strides = array<i32>} : memref<1x4xf32, #tpu.memory_space<vmem>>, vector<1x4xf32>,
      %36 = vector.extract_strided_slice %34 {offsets = [0, 0], sizes = [1, 1], strides = [1, 1]} : vector<1x4xf32> to vector<1x1xf32>
      %c0_29 = arith.constant 0 : index
      %c0_30 = arith.constant 0 : index
      %37 = vector.load %arg8[%c0_29, %c0_30] : memref<4x64xf32, #tpu.memory_space<vmem>>, vector<1x64xf32>
      %38 = vector.broadcast %36 : vector<1x1xf32> to vector<1x64xf32>
      %39 = arith.mulf %38, %37 : vector<1x64xf32>
      %40 = vector.extract_strided_slice %34 {offsets = [0, 1], sizes = [1, 1], strides = [1, 1]} : vector<1x4xf32> to vector<1x1xf32>
      %c1 = arith.constant 1 : index
      %c0_31 = arith.constant 0 : index
      %41 = vector.load %arg8[%c1, %c0_31] : memref<4x64xf32, #tpu.memory_space<vmem>>, vector<1x64xf32>
      %42 = vector.broadcast %40 : vector<1x1xf32> to vector<1x64xf32>
      %43 = arith.mulf %42, %41 : vector<1x64xf32>
      %44 = arith.addf %39, %43 : vector<1x64xf32>
      %45 = vector.extract_strided_slice %34 {offsets = [0, 2], sizes = [1, 1], strides = [1, 1]} : vector<1x4xf32> to vector<1x1xf32>
      %c2 = arith.constant 2 : index
      %c0_32 = arith.constant 0 : index
      %46 = vector.load %arg8[%c2, %c0_32] : memref<4x64xf32, #tpu.memory_space<vmem>>, vector<1x64xf32>
      %47 = vector.broadcast %45 : vector<1x1xf32> to vector<1x64xf32>
      %48 = arith.mulf %47, %46 : vector<1x64xf32>
      %49 = arith.addf %44, %48 : vector<1x64xf32>
      %50 = vector.extract_strided_slice %34 {offsets = [0, 3], sizes = [1, 1], strides = [1, 1]} : vector<1x4xf32> to vector<1x1xf32>
      %c3 = arith.constant 3 : index
      %c0_33 = arith.constant 0 : index
      %51 = vector.load %arg8[%c3, %c0_33] : memref<4x64xf32, #tpu.memory_space<vmem>>, vector<1x64xf32>
      %52 = vector.broadcast %50 : vector<1x1xf32> to vector<1x64xf32>
      %53 = arith.mulf %52, %51 : vector<1x64xf32>
      %54 = arith.addf %49, %53 : vector<1x64xf32>
      %c0_34 = arith.constant 0 : index
      %c0_35 = arith.constant 0 : index
      %55 = vector.load %arg18[%c0_34, %c0_35] : memref<4x128xf32, #tpu.memory_space<vmem>>, vector<1x64xf32>
      tpu.vector_store %arg18[%c0_34, %c0_35], %54 {strides = array<i32>} : memref<4x128xf32, #tpu.memory_space<vmem>>, vector<1x64xf32>,
      %56 = vector.extract_strided_slice %34 {offsets = [0, 0], sizes = [1, 1], strides = [1, 1]} : vector<1x4xf32> to vector<1x1xf32>
      %c0_36 = arith.constant 0 : index
      %c0_37 = arith.constant 0 : index
      %57 = vector.load %arg10[%c0_36, %c0_37] : memref<4x64xf32, #tpu.memory_space<vmem>>, vector<1x64xf32>
      %58 = vector.broadcast %56 : vector<1x1xf32> to vector<1x64xf32>
      %59 = arith.mulf %58, %57 : vector<1x64xf32>
      %60 = vector.extract_strided_slice %34 {offsets = [0, 1], sizes = [1, 1], strides = [1, 1]} : vector<1x4xf32> to vector<1x1xf32>
      %c1_38 = arith.constant 1 : index
      %c0_39 = arith.constant 0 : index
      %61 = vector.load %arg10[%c1_38, %c0_39] : memref<4x64xf32, #tpu.memory_space<vmem>>, vector<1x64xf32>
      %62 = vector.broadcast %60 : vector<1x1xf32> to vector<1x64xf32>
      %63 = arith.mulf %62, %61 : vector<1x64xf32>
      %64 = arith.addf %59, %63 : vector<1x64xf32>
      %65 = vector.extract_strided_slice %34 {offsets = [0, 2], sizes = [1, 1], strides = [1, 1]} : vector<1x4xf32> to vector<1x1xf32>
      %c2_40 = arith.constant 2 : index
      %c0_41 = arith.constant 0 : index
      %66 = vector.load %arg10[%c2_40, %c0_41] : memref<4x64xf32, #tpu.memory_space<vmem>>, vector<1x64xf32>
      %67 = vector.broadcast %65 : vector<1x1xf32> to vector<1x64xf32>
      %68 = arith.mulf %67, %66 : vector<1x64xf32>
      %69 = arith.addf %64, %68 : vector<1x64xf32>
      %70 = vector.extract_strided_slice %34 {offsets = [0, 3], sizes = [1, 1], strides = [1, 1]} : vector<1x4xf32> to vector<1x1xf32>
      %c3_42 = arith.constant 3 : index
      %c0_43 = arith.constant 0 : index
      %71 = vector.load %arg10[%c3_42, %c0_43] : memref<4x64xf32, #tpu.memory_space<vmem>>, vector<1x64xf32>
      %72 = vector.broadcast %70 : vector<1x1xf32> to vector<1x64xf32>
      %73 = arith.mulf %72, %71 : vector<1x64xf32>
      %74 = arith.addf %69, %73 : vector<1x64xf32>
      %c1_44 = arith.constant 1 : index
      %c0_45 = arith.constant 0 : index
      %75 = vector.load %arg18[%c1_44, %c0_45] : memref<4x128xf32, #tpu.memory_space<vmem>>, vector<1x64xf32>
      tpu.vector_store %arg18[%c1_44, %c0_45], %74 {strides = array<i32>} : memref<4x128xf32, #tpu.memory_space<vmem>>, vector<1x64xf32>,
      %76 = vector.extract_strided_slice %34 {offsets = [0, 0], sizes = [1, 1], strides = [1, 1]} : vector<1x4xf32> to vector<1x1xf32>
      %c0_46 = arith.constant 0 : index
      %c0_47 = arith.constant 0 : index
      %77 = vector.load %arg12[%c0_46, %c0_47] : memref<4x64xf32, #tpu.memory_space<vmem>>, vector<1x64xf32>
      %78 = vector.broadcast %76 : vector<1x1xf32> to vector<1x64xf32>
      %79 = arith.mulf %78, %77 : vector<1x64xf32>
      %80 = vector.extract_strided_slice %34 {offsets = [0, 1], sizes = [1, 1], strides = [1, 1]} : vector<1x4xf32> to vector<1x1xf32>
      %c1_48 = arith.constant 1 : index
      %c0_49 = arith.constant 0 : index
      %81 = vector.load %arg12[%c1_48, %c0_49] : memref<4x64xf32, #tpu.memory_space<vmem>>, vector<1x64xf32>
      %82 = vector.broadcast %80 : vector<1x1xf32> to vector<1x64xf32>
      %83 = arith.mulf %82, %81 : vector<1x64xf32>
      %84 = arith.addf %79, %83 : vector<1x64xf32>
      %85 = vector.extract_strided_slice %34 {offsets = [0, 2], sizes = [1, 1], strides = [1, 1]} : vector<1x4xf32> to vector<1x1xf32>
      %c2_50 = arith.constant 2 : index
      %c0_51 = arith.constant 0 : index
      %86 = vector.load %arg12[%c2_50, %c0_51] : memref<4x64xf32, #tpu.memory_space<vmem>>, vector<1x64xf32>
      %87 = vector.broadcast %85 : vector<1x1xf32> to vector<1x64xf32>
      %88 = arith.mulf %87, %86 : vector<1x64xf32>
      %89 = arith.addf %84, %88 : vector<1x64xf32>
      %90 = vector.extract_strided_slice %34 {offsets = [0, 3], sizes = [1, 1], strides = [1, 1]} : vector<1x4xf32> to vector<1x1xf32>
      %c3_52 = arith.constant 3 : index
      %c0_53 = arith.constant 0 : index
      %91 = vector.load %arg12[%c3_52, %c0_53] : memref<4x64xf32, #tpu.memory_space<vmem>>, vector<1x64xf32>
      %92 = vector.broadcast %90 : vector<1x1xf32> to vector<1x64xf32>
      %93 = arith.mulf %92, %91 : vector<1x64xf32>
      %94 = arith.addf %89, %93 : vector<1x64xf32>
      %c2_54 = arith.constant 2 : index
      %c0_55 = arith.constant 0 : index
      %95 = vector.load %arg18[%c2_54, %c0_55] : memref<4x128xf32, #tpu.memory_space<vmem>>, vector<1x64xf32>
      tpu.vector_store %arg18[%c2_54, %c0_55], %94 {strides = array<i32>} : memref<4x128xf32, #tpu.memory_space<vmem>>, vector<1x64xf32>,
      %96 = vector.extract_strided_slice %34 {offsets = [0, 0], sizes = [1, 1], strides = [1, 1]} : vector<1x4xf32> to vector<1x1xf32>
      %c0_56 = arith.constant 0 : index
      %c0_57 = arith.constant 0 : index
      %97 = vector.load %arg14[%c0_56, %c0_57] : memref<4x128xf32, #tpu.memory_space<vmem>>, vector<1x128xf32>
      %98 = vector.broadcast %96 : vector<1x1xf32> to vector<1x128xf32>
      %99 = arith.mulf %98, %97 : vector<1x128xf32>
      %100 = vector.extract_strided_slice %34 {offsets = [0, 1], sizes = [1, 1], strides = [1, 1]} : vector<1x4xf32> to vector<1x1xf32>
      %c1_58 = arith.constant 1 : index
      %c0_59 = arith.constant 0 : index
      %101 = vector.load %arg14[%c1_58, %c0_59] : memref<4x128xf32, #tpu.memory_space<vmem>>, vector<1x128xf32>
      %102 = vector.broadcast %100 : vector<1x1xf32> to vector<1x128xf32>
      %103 = arith.mulf %102, %101 : vector<1x128xf32>
      %104 = arith.addf %99, %103 : vector<1x128xf32>
      %105 = vector.extract_strided_slice %34 {offsets = [0, 2], sizes = [1, 1], strides = [1, 1]} : vector<1x4xf32> to vector<1x1xf32>
      %c2_60 = arith.constant 2 : index
      %c0_61 = arith.constant 0 : index
      %106 = vector.load %arg14[%c2_60, %c0_61] : memref<4x128xf32, #tpu.memory_space<vmem>>, vector<1x128xf32>
      %107 = vector.broadcast %105 : vector<1x1xf32> to vector<1x128xf32>
      %108 = arith.mulf %107, %106 : vector<1x128xf32>
      %109 = arith.addf %104, %108 : vector<1x128xf32>
      %110 = vector.extract_strided_slice %34 {offsets = [0, 3], sizes = [1, 1], strides = [1, 1]} : vector<1x4xf32> to vector<1x1xf32>
      %c3_62 = arith.constant 3 : index
      %c0_63 = arith.constant 0 : index
      %111 = vector.load %arg14[%c3_62, %c0_63] : memref<4x128xf32, #tpu.memory_space<vmem>>, vector<1x128xf32>
      %112 = vector.broadcast %110 : vector<1x1xf32> to vector<1x128xf32>
      %113 = arith.mulf %112, %111 : vector<1x128xf32>
      %114 = arith.addf %109, %113 : vector<1x128xf32>
      %c3_64 = arith.constant 3 : index
      %c0_65 = arith.constant 0 : index
      %115 = vector.load %arg18[%c3_64, %c0_65] : memref<4x128xf32, #tpu.memory_space<vmem>>, vector<1x128xf32>
      tpu.vector_store %arg18[%c3_64, %c0_65], %114 {strides = array<i32>} : memref<4x128xf32, #tpu.memory_space<vmem>>, vector<1x128xf32>,
    } else {
    }
    %c0 = arith.constant 0 : index
    %c0_1 = arith.constant 0 : index
    %3 = vector.load %arg16[%c0, %c0_1] : memref<8x256xf32, #tpu.memory_space<vmem>>, vector<8x256xf32>
    %c0_2 = arith.constant 0 : index
    %c0_3 = arith.constant 0 : index
    %4 = vector.load %arg6[%c0_2, %c0_3] : memref<8x1536xf32, #tpu.memory_space<vmem>>, vector<8x1536xf32>
    %5 = arith.truncf %4 : vector<8x1536xf32> to vector<8x1536xbf16>
    %c0_4 = arith.constant 0 : index
    %c0_5 = arith.constant 0 : index
    %6 = vector.load %arg7[%c0_4, %c0_5] : memref<1536x256xbf16, #tpu.memory_space<vmem>>, vector<1536x256xbf16>
    %cst = arith.constant dense<0.000000e+00> : vector<8x256xf32>
    %7 = tpu.matmul %5, %6, %cst {dimension_numbers = #tpu.dot_dimension_numbers<[1], [0], [0], [1], [0, 0, 1, 1], [], []>} : vector<8x1536xbf16>, vector<1536x256xbf16>, vector<8x256xf32> -> vector<8x256xf32>
    %8 = arith.addf %3, %7 : vector<8x256xf32>
    %c0_6 = arith.constant 0 : index
    %c0_7 = arith.constant 0 : index
    %9 = vector.load %arg16[%c0_6, %c0_7] : memref<8x256xf32, #tpu.memory_space<vmem>>, vector<8x256xf32>
    tpu.vector_store %arg16[%c0_6, %c0_7], %8 {strides = array<i32>} : memref<8x256xf32, #tpu.memory_space<vmem>>, vector<8x256xf32>,
    %c1_i32 = arith.constant 1 : i32
    %10 = arith.cmpi eq, %arg0, %c1_i32 : i32
    %11 = arith.extui %10 : i1 to i32
    %c0_i32_8 = arith.constant 0 : i32
    %12 = arith.cmpi ne, %11, %c0_i32_8 : i32
    scf.if %12 {
      %c0_9 = arith.constant 0 : index
      %c0_10 = arith.constant 0 : index
      %13 = vector.load %arg17[%c0_9, %c0_10] : memref<1x4xf32, #tpu.memory_space<vmem>>, vector<1x4xf32>
      %c0_11 = arith.constant 0 : index
      %c0_12 = arith.constant 0 : index
      %14 = vector.load %arg16[%c0_11, %c0_12] : memref<8x256xf32, #tpu.memory_space<vmem>>, vector<8x64xf32>
      %c0_13 = arith.constant 0 : index
      %c64 = arith.constant 64 : index
      %15 = vector.load %arg16[%c0_13, %c64] : memref<8x256xf32, #tpu.memory_space<vmem>>, vector<8x64xf32>
      %c0_14 = arith.constant 0 : index
      %c128 = arith.constant 128 : index
      %16 = vector.load %arg16[%c0_14, %c128] : memref<8x256xf32, #tpu.memory_space<vmem>>, vector<8x64xf32>
      %c0_15 = arith.constant 0 : index
      %c192 = arith.constant 192 : index
      %17 = vector.load %arg16[%c0_15, %c192] : memref<8x256xf32, #tpu.memory_space<vmem>>, vector<8x64xf32>
      %18 = vector.extract_strided_slice %13 {offsets = [0, 0], sizes = [1, 1], strides = [1, 1]} : vector<1x4xf32> to vector<1x1xf32>
      %19 = vector.broadcast %18 : vector<1x1xf32> to vector<8x64xf32>
      %20 = arith.mulf %19, %14 : vector<8x64xf32>
      %21 = vector.extract_strided_slice %13 {offsets = [0, 1], sizes = [1, 1], strides = [1, 1]} : vector<1x4xf32> to vector<1x1xf32>
      %22 = vector.broadcast %21 : vector<1x1xf32> to vector<8x64xf32>
      %23 = arith.mulf %22, %15 : vector<8x64xf32>
      %24 = arith.addf %20, %23 : vector<8x64xf32>
      %25 = vector.extract_strided_slice %13 {offsets = [0, 2], sizes = [1, 1], strides = [1, 1]} : vector<1x4xf32> to vector<1x1xf32>
      %26 = vector.broadcast %25 : vector<1x1xf32> to vector<8x64xf32>
      %27 = arith.mulf %26, %16 : vector<8x64xf32>
      %28 = arith.addf %24, %27 : vector<8x64xf32>
      %29 = vector.extract_strided_slice %13 {offsets = [0, 3], sizes = [1, 1], strides = [1, 1]} : vector<1x4xf32> to vector<1x1xf32>
      %30 = vector.broadcast %29 : vector<1x1xf32> to vector<8x64xf32>
      %31 = arith.mulf %30, %17 : vector<8x64xf32>
      %32 = arith.addf %28, %31 : vector<8x64xf32>
      %c0_16 = arith.constant 0 : index
      %c0_17 = arith.constant 0 : index
      %33 = vector.load %arg18[%c0_16, %c0_17] : memref<4x128xf32, #tpu.memory_space<vmem>>, vector<1x64xf32>
      %34 = vector.broadcast %33 : vector<1x64xf32> to vector<8x64xf32>
      %35 = arith.addf %32, %34 : vector<8x64xf32>
      %cst_18 = arith.constant 0.000000e+00 : f32
      %36 = vector.broadcast %cst_18 : f32 to vector<8x64xf32>
      %37 = arith.maximumf %35, %36 : vector<8x64xf32>
      %c0_19 = arith.constant 0 : index
      %c0_20 = arith.constant 0 : index
      %38 = vector.load %arg9[%c0_19, %c0_20] : memref<64x256xf32, #tpu.memory_space<vmem>>, vector<64x256xf32>
      %cst_21 = arith.constant dense<0.000000e+00> : vector<8x256xf32>
      %39 = tpu.matmul %37, %38, %cst_21 {dimension_numbers = #tpu.dot_dimension_numbers<[1], [0], [0], [1], [0, 0, 1, 1], [], []>} : vector<8x64xf32>, vector<64x256xf32>, vector<8x256xf32> -> vector<8x256xf32>
      %40 = vector.extract_strided_slice %39 {offsets = [0, 0], sizes = [8, 64], strides = [1, 1]} : vector<8x256xf32> to vector<8x64xf32>
      %41 = vector.extract_strided_slice %39 {offsets = [0, 64], sizes = [8, 64], strides = [1, 1]} : vector<8x256xf32> to vector<8x64xf32>
      %42 = vector.extract_strided_slice %39 {offsets = [0, 128], sizes = [8, 64], strides = [1, 1]} : vector<8x256xf32> to vector<8x64xf32>
      %43 = vector.extract_strided_slice %39 {offsets = [0, 192], sizes = [8, 64], strides = [1, 1]} : vector<8x256xf32> to vector<8x64xf32>
      %44 = vector.extract_strided_slice %13 {offsets = [0, 0], sizes = [1, 1], strides = [1, 1]} : vector<1x4xf32> to vector<1x1xf32>
      %45 = vector.broadcast %44 : vector<1x1xf32> to vector<8x64xf32>
      %46 = arith.mulf %45, %40 : vector<8x64xf32>
      %47 = vector.extract_strided_slice %13 {offsets = [0, 1], sizes = [1, 1], strides = [1, 1]} : vector<1x4xf32> to vector<1x1xf32>
      %48 = vector.broadcast %47 : vector<1x1xf32> to vector<8x64xf32>
      %49 = arith.mulf %48, %41 : vector<8x64xf32>
      %50 = arith.addf %46, %49 : vector<8x64xf32>
      %51 = vector.extract_strided_slice %13 {offsets = [0, 2], sizes = [1, 1], strides = [1, 1]} : vector<1x4xf32> to vector<1x1xf32>
      %52 = vector.broadcast %51 : vector<1x1xf32> to vector<8x64xf32>
      %53 = arith.mulf %52, %42 : vector<8x64xf32>
      %54 = arith.addf %50, %53 : vector<8x64xf32>
      %55 = vector.extract_strided_slice %13 {offsets = [0, 3], sizes = [1, 1], strides = [1, 1]} : vector<1x4xf32> to vector<1x1xf32>
      %56 = vector.broadcast %55 : vector<1x1xf32> to vector<8x64xf32>
      %57 = arith.mulf %56, %43 : vector<8x64xf32>
      %58 = arith.addf %54, %57 : vector<8x64xf32>
      %c1 = arith.constant 1 : index
      %c0_22 = arith.constant 0 : index
      %59 = vector.load %arg18[%c1, %c0_22] : memref<4x128xf32, #tpu.memory_space<vmem>>, vector<1x64xf32>
      %60 = vector.broadcast %59 : vector<1x64xf32> to vector<8x64xf32>
      %61 = arith.addf %58, %60 : vector<8x64xf32>
      %cst_23 = arith.constant dense<0.000000e+00> : vector<64xf32>
      %62 = vector.multi_reduction <add>, %61, %cst_23 [0] : vector<8x64xf32> to vector<64xf32>
      %63 = vector.shape_cast %62 : vector<64xf32> to vector<1x64xf32>
      %cst_24 = arith.constant 8.000000e+00 : f32
      %64 = vector.broadcast %cst_24 : f32 to vector<1x64xf32>
      %65 = arith.divf %63, %64 : vector<1x64xf32>
      %66 = vector.broadcast %65 : vector<1x64xf32> to vector<8x64xf32>
      %67 = arith.subf %61, %66 : vector<8x64xf32>
      %68 = arith.mulf %67, %67 : vector<8x64xf32>
      %cst_25 = arith.constant dense<0.000000e+00> : vector<64xf32>
      %69 = vector.multi_reduction <add>, %68, %cst_25 [0] : vector<8x64xf32> to vector<64xf32>
      %70 = vector.shape_cast %69 : vector<64xf32> to vector<1x64xf32>
      %cst_26 = arith.constant 8.000000e+00 : f32
      %71 = vector.broadcast %cst_26 : f32 to vector<1x64xf32>
      %72 = arith.divf %70, %71 : vector<1x64xf32>
      %73 = vector.broadcast %65 : vector<1x64xf32> to vector<8x64xf32>
      %74 = arith.subf %61, %73 : vector<8x64xf32>
      %cst_27 = arith.constant 9.99999974E-6 : f32
      %75 = vector.broadcast %cst_27 : f32 to vector<1x64xf32>
      %76 = arith.addf %72, %75 : vector<1x64xf32>
      %77 = math.rsqrt %76 : vector<1x64xf32>
      %78 = vector.broadcast %77 : vector<1x64xf32> to vector<8x64xf32>
      %79 = arith.mulf %74, %78 : vector<8x64xf32>
      %cst_28 = arith.constant 0.000000e+00 : f32
      %80 = vector.broadcast %cst_28 : f32 to vector<8x64xf32>
      %81 = arith.maximumf %79, %80 : vector<8x64xf32>
      %c0_29 = arith.constant 0 : index
      %c0_30 = arith.constant 0 : index
      %82 = vector.load %arg11[%c0_29, %c0_30] : memref<64x256xf32, #tpu.memory_space<vmem>>, vector<64x256xf32>
      %cst_31 = arith.constant dense<0.000000e+00> : vector<8x256xf32>
      %83 = tpu.matmul %81, %82, %cst_31 {dimension_numbers = #tpu.dot_dimension_numbers<[1], [0], [0], [1], [0, 0, 1, 1], [], []>} : vector<8x64xf32>, vector<64x256xf32>, vector<8x256xf32> -> vector<8x256xf32>
      %84 = vector.extract_strided_slice %83 {offsets = [0, 0], sizes = [8, 64], strides = [1, 1]} : vector<8x256xf32> to vector<8x64xf32>
      %85 = vector.extract_strided_slice %83 {offsets = [0, 64], sizes = [8, 64], strides = [1, 1]} : vector<8x256xf32> to vector<8x64xf32>
      %86 = vector.extract_strided_slice %83 {offsets = [0, 128], sizes = [8, 64], strides = [1, 1]} : vector<8x256xf32> to vector<8x64xf32>
      %87 = vector.extract_strided_slice %83 {offsets = [0, 192], sizes = [8, 64], strides = [1, 1]} : vector<8x256xf32> to vector<8x64xf32>
      %88 = vector.extract_strided_slice %13 {offsets = [0, 0], sizes = [1, 1], strides = [1, 1]} : vector<1x4xf32> to vector<1x1xf32>
      %89 = vector.broadcast %88 : vector<1x1xf32> to vector<8x64xf32>
      %90 = arith.mulf %89, %84 : vector<8x64xf32>
      %91 = vector.extract_strided_slice %13 {offsets = [0, 1], sizes = [1, 1], strides = [1, 1]} : vector<1x4xf32> to vector<1x1xf32>
      %92 = vector.broadcast %91 : vector<1x1xf32> to vector<8x64xf32>
      %93 = arith.mulf %92, %85 : vector<8x64xf32>
      %94 = arith.addf %90, %93 : vector<8x64xf32>
      %95 = vector.extract_strided_slice %13 {offsets = [0, 2], sizes = [1, 1], strides = [1, 1]} : vector<1x4xf32> to vector<1x1xf32>
      %96 = vector.broadcast %95 : vector<1x1xf32> to vector<8x64xf32>
      %97 = arith.mulf %96, %86 : vector<8x64xf32>
      %98 = arith.addf %94, %97 : vector<8x64xf32>
      %99 = vector.extract_strided_slice %13 {offsets = [0, 3], sizes = [1, 1], strides = [1, 1]} : vector<1x4xf32> to vector<1x1xf32>
      %100 = vector.broadcast %99 : vector<1x1xf32> to vector<8x64xf32>
      %101 = arith.mulf %100, %87 : vector<8x64xf32>
      %102 = arith.addf %98, %101 : vector<8x64xf32>
      %c2 = arith.constant 2 : index
      %c0_32 = arith.constant 0 : index
      %103 = vector.load %arg18[%c2, %c0_32] : memref<4x128xf32, #tpu.memory_space<vmem>>, vector<1x64xf32>
      %104 = vector.broadcast %103 : vector<1x64xf32> to vector<8x64xf32>
      %105 = arith.addf %102, %104 : vector<8x64xf32>
      %cst_33 = arith.constant dense<0.000000e+00> : vector<64xf32>
      %106 = vector.multi_reduction <add>, %105, %cst_33 [0] : vector<8x64xf32> to vector<64xf32>
      %107 = vector.shape_cast %106 : vector<64xf32> to vector<1x64xf32>
      %cst_34 = arith.constant 8.000000e+00 : f32
      %108 = vector.broadcast %cst_34 : f32 to vector<1x64xf32>
      %109 = arith.divf %107, %108 : vector<1x64xf32>
      %110 = vector.broadcast %109 : vector<1x64xf32> to vector<8x64xf32>
      %111 = arith.subf %105, %110 : vector<8x64xf32>
      %112 = arith.mulf %111, %111 : vector<8x64xf32>
      %cst_35 = arith.constant dense<0.000000e+00> : vector<64xf32>
      %113 = vector.multi_reduction <add>, %112, %cst_35 [0] : vector<8x64xf32> to vector<64xf32>
      %114 = vector.shape_cast %113 : vector<64xf32> to vector<1x64xf32>
      %cst_36 = arith.constant 8.000000e+00 : f32
      %115 = vector.broadcast %cst_36 : f32 to vector<1x64xf32>
      %116 = arith.divf %114, %115 : vector<1x64xf32>
      %117 = vector.broadcast %109 : vector<1x64xf32> to vector<8x64xf32>
      %118 = arith.subf %105, %117 : vector<8x64xf32>
      %cst_37 = arith.constant 9.99999974E-6 : f32
      %119 = vector.broadcast %cst_37 : f32 to vector<1x64xf32>
      %120 = arith.addf %116, %119 : vector<1x64xf32>
      %121 = math.rsqrt %120 : vector<1x64xf32>
      %122 = vector.broadcast %121 : vector<1x64xf32> to vector<8x64xf32>
      %123 = arith.mulf %118, %122 : vector<8x64xf32>
      %cst_38 = arith.constant 0.000000e+00 : f32
      %124 = vector.broadcast %cst_38 : f32 to vector<8x64xf32>
      %125 = arith.maximumf %123, %124 : vector<8x64xf32>
      %c0_39 = arith.constant 0 : index
      %c0_40 = arith.constant 0 : index
      %126 = vector.load %arg13[%c0_39, %c0_40] : memref<64x512xf32, #tpu.memory_space<vmem>>, vector<64x512xf32>
      %cst_41 = arith.constant dense<0.000000e+00> : vector<8x512xf32>
      %127 = tpu.matmul %125, %126, %cst_41 {dimension_numbers = #tpu.dot_dimension_numbers<[1], [0], [0], [1], [0, 0, 1, 1], [], []>} : vector<8x64xf32>, vector<64x512xf32>, vector<8x512xf32> -> vector<8x512xf32>
      %128 = vector.extract_strided_slice %127 {offsets = [0, 0], sizes = [8, 128], strides = [1, 1]} : vector<8x512xf32> to vector<8x128xf32>
      %129 = vector.extract_strided_slice %127 {offsets = [0, 128], sizes = [8, 128], strides = [1, 1]} : vector<8x512xf32> to vector<8x128xf32>
      %130 = vector.extract_strided_slice %127 {offsets = [0, 256], sizes = [8, 128], strides = [1, 1]} : vector<8x512xf32> to vector<8x128xf32>
      %131 = vector.extract_strided_slice %127 {offsets = [0, 384], sizes = [8, 128], strides = [1, 1]} : vector<8x512xf32> to vector<8x128xf32>
      %132 = vector.extract_strided_slice %13 {offsets = [0, 0], sizes = [1, 1], strides = [1, 1]} : vector<1x4xf32> to vector<1x1xf32>
      %133 = vector.broadcast %132 : vector<1x1xf32> to vector<8x128xf32>
      %134 = arith.mulf %133, %128 : vector<8x128xf32>
      %135 = vector.extract_strided_slice %13 {offsets = [0, 1], sizes = [1, 1], strides = [1, 1]} : vector<1x4xf32> to vector<1x1xf32>
      %136 = vector.broadcast %135 : vector<1x1xf32> to vector<8x128xf32>
      %137 = arith.mulf %136, %129 : vector<8x128xf32>
      %138 = arith.addf %134, %137 : vector<8x128xf32>
      %139 = vector.extract_strided_slice %13 {offsets = [0, 2], sizes = [1, 1], strides = [1, 1]} : vector<1x4xf32> to vector<1x1xf32>
      %140 = vector.broadcast %139 : vector<1x1xf32> to vector<8x128xf32>
      %141 = arith.mulf %140, %130 : vector<8x128xf32>
      %142 = arith.addf %138, %141 : vector<8x128xf32>
      %143 = vector.extract_strided_slice %13 {offsets = [0, 3], sizes = [1, 1], strides = [1, 1]} : vector<1x4xf32> to vector<1x1xf32>
      %144 = vector.broadcast %143 : vector<1x1xf32> to vector<8x128xf32>
      %145 = arith.mulf %144, %131 : vector<8x128xf32>
      %146 = arith.addf %142, %145 : vector<8x128xf32>
      %c3 = arith.constant 3 : index
      %c0_42 = arith.constant 0 : index
      %147 = vector.load %arg18[%c3, %c0_42] : memref<4x128xf32, #tpu.memory_space<vmem>>, vector<1x128xf32>
      %148 = vector.broadcast %147 : vector<1x128xf32> to vector<8x128xf32>
      %149 = arith.addf %146, %148 : vector<8x128xf32>
      %c0_43 = arith.constant 0 : index
      %c0_44 = arith.constant 0 : index
      %150 = vector.load %arg15[%c0_43, %c0_44] : memref<8x128xf32, #tpu.memory_space<vmem>>, vector<8x128xf32>
      tpu.vector_store %arg15[%c0_43, %c0_44], %149 {strides = array<i32>} : memref<8x128xf32, #tpu.memory_space<vmem>>, vector<8x128xf32>,
    } else {
    }
    return
  }
  func.func @transform_0(%arg0: i32) -> (i32, i32) {
    %c0_i32 = arith.constant 0 : i32
    %c0_i32_0 = arith.constant 0 : i32
    %c0_i32_1 = arith.constant 0 : i32
    return %c0_i32, %c0_i32_0 : i32, i32
  }
  func.func @transform_1(%arg0: i32) -> (i32, i32) {
    %c0_i32 = arith.constant 0 : i32
    %c0_i32_0 = arith.constant 0 : i32
    %c0_i32_1 = arith.constant 0 : i32
    return %c0_i32, %c0_i32_0 : i32, i32
  }
  func.func @transform_2(%arg0: i32) -> (i32, i32) {
    %c0_i32 = arith.constant 0 : i32
    %c0_i32_0 = arith.constant 0 : i32
    %c0_i32_1 = arith.constant 0 : i32
    return %c0_i32, %c0_i32_0 : i32, i32
  }
  func.func @transform_3(%arg0: i32) -> (i32, i32) {
    %c0_i32 = arith.constant 0 : i32
    %c0_i32_0 = arith.constant 0 : i32
    %c0_i32_1 = arith.constant 0 : i32
    return %c0_i32, %c0_i32_0 : i32, i32
  }
  func.func @transform_4(%arg0: i32) -> (i32, i32) {
    %c0_i32 = arith.constant 0 : i32
    %c0_i32_0 = arith.constant 0 : i32
    %c0_i32_1 = arith.constant 0 : i32
    return %c0_i32, %c0_i32_0 : i32, i32
  }
  func.func @transform_5(%arg0: i32) -> (i32, i32) {
    %c0_i32 = arith.constant 0 : i32
    %c0_i32_0 = arith.constant 0 : i32
    return %c0_i32, %arg0 : i32, i32
  }
  func.func @transform_6(%arg0: i32) -> (i32, i32) {
    %c0_i32 = arith.constant 0 : i32
    %c0_i32_0 = arith.constant 0 : i32
    return %arg0, %c0_i32 : i32, i32
  }
  func.func @transform_7(%arg0: i32) -> (i32, i32) {
    %c0_i32 = arith.constant 0 : i32
    %c0_i32_0 = arith.constant 0 : i32
    %c0_i32_1 = arith.constant 0 : i32
    return %c0_i32, %c0_i32_0 : i32, i32
  }
  func.func @transform_8(%arg0: i32) -> (i32, i32) {
    %c0_i32 = arith.constant 0 : i32
    %c0_i32_0 = arith.constant 0 : i32
    %c0_i32_1 = arith.constant 0 : i32
    return %c0_i32, %c0_i32_0 : i32, i32
  }
  func.func @transform_9(%arg0: i32) -> (i32, i32) {
    %c0_i32 = arith.constant 0 : i32
    %c0_i32_0 = arith.constant 0 : i32
    %c0_i32_1 = arith.constant 0 : i32
    return %c0_i32, %c0_i32_0 : i32, i32
  }
  func.func @transform_10(%arg0: i32) -> (i32, i32) {
    %c0_i32 = arith.constant 0 : i32
    %c0_i32_0 = arith.constant 0 : i32
    %c0_i32_1 = arith.constant 0 : i32
    return %c0_i32, %c0_i32_0 : i32, i32
  }
  func.func @transform_11(%arg0: i32) -> (i32, i32) {
    %c0_i32 = arith.constant 0 : i32
    %c0_i32_0 = arith.constant 0 : i32
    %c0_i32_1 = arith.constant 0 : i32
    return %c0_i32, %c0_i32_0 : i32, i32
  }
  func.func @transform_12(%arg0: i32) -> (i32, i32) {
    %c0_i32 = arith.constant 0 : i32
    %c0_i32_0 = arith.constant 0 : i32
    %c0_i32_1 = arith.constant 0 : i32
    return %c0_i32, %c0_i32_0 : i32, i32
  }
  func.func @transform_13(%arg0: i32) -> (i32, i32) {
    %c0_i32 = arith.constant 0 : i32
    %c0_i32_0 = arith.constant 0 : i32
    %c0_i32_1 = arith.constant 0 : i32
    return %c0_i32, %c0_i32_0 : i32, i32
  }
  func.func @transform_14(%arg0: i32) -> (i32, i32) {
    %c0_i32 = arith.constant 0 : i32
    %c0_i32_0 = arith.constant 0 : i32
    %c0_i32_1 = arith.constant 0 : i32
    return %c0_i32, %c0_i32_0 : i32, i32
  }
}

</mosaic_0001>

<bundles_post_ra>
// kernel: hhn_mlpb_forward.1
= control target key start
LH: loop header
LB: loop body
LE: loop exit
PB: predicated region body
PF: predicated region fallthrough
CT: control target
= control target key end

     0   :  { %s4815_s0 = inlined_call_operand.hbm [shape: f32[1,8], index: 0, kind: input, shape index: {}]   ;;  %s4816_s1 = inlined_call_operand.hbm [shape: f32[8,64], index: 1, kind: input, shape index: {}]   ;;  %s4817_s2 = inlined_call_operand.hbm [shape: f32[1,64], index: 2, kind: input, shape index: {}]   ;;  %s4818_s3 = inlined_call_operand.vmem [shape: f32[64,4], index: 3, kind: input, shape index: {}]   ;;  %s4819_s4 = inlined_call_operand.hbm [shape: f32[1,4], index: 4, kind: input, shape index: {}]   ;;  %s4820_s5 = inlined_call_operand.vmem [shape: f32[8,3072], index: 5, kind: input, shape index: {}]   ;;  %s4821_s6 = inlined_call_operand.hbm [shape: bf16[3072,256], index: 6, kind: input, shape index: {}]   ;;  %s4822_s7 = inlined_call_operand.hbm [shape: f32[4,64], index: 7, kind: input, shape index: {}]   ;;  %s4823_s8 = inlined_call_operand.hbm [shape: f32[64,256], index: 8, kind: input, shape index: {}]   ;;  %s4824_s9 = inlined_call_operand.hbm [shape: f32[4,64], index: 9, kind: input, shape index: {}]   ;;  %s4825_s10 = inlined_call_operand.hbm [shape: f32[64,256], index: 10, kind: input, shape index: {}]   ;;  %s4826_s11 = inlined_call_operand.hbm [shape: f32[4,64], index: 11, kind: input, shape index: {}]   ;;  %s4827_s12 = inlined_call_operand.hbm [shape: f32[64,512], index: 12, kind: input, shape index: {}]   ;;  %s4828_s13 = inlined_call_operand.hbm [shape: f32[4,128], index: 13, kind: input, shape index: {}]   ;;  %s4829_s14 = inlined_call_operand.hbm [shape: f32[8,128], index: 14, kind: output, shape index: {}]  }
   0x1   :  { %4834 = sst [smem:[#allocation35_spill]] %s4815_s0 }
   0x2   :  { %4835 = sst [smem:[#allocation36_spill]] %s4816_s1 }
   0x3   :  { %4836 = sst [smem:[#allocation37_spill]] %s4818_s3 }
   0x4   :  { %4837 = sst [smem:[#allocation38_spill]] %s4829_s14 }
   0x5   :  { %19 = vsyncpa [#allocation6], 0 }
   0x6   :  { %20 = vsyncpa [#allocation9], 0 }
   0x7   :  { %21 = vsyncpa [#allocation12], 0 }
   0x8   :  { %22 = vsyncpa [#allocation17], 0 }
   0x9   :  { %23 = vsyncpa [#allocation20], 0 }
   0xa   :  { %24 = vsyncpa [#allocation23], 0 }
   0xb   :  { %25 = vsyncpa [#allocation7], 0  ;;  %s4269_s29 = smov 0   ;;  %s4271_s30 = smov 0  }
   0xc   :  { %s4273_s15 = smov 0   ;;  %s4275_s16 = smov 0  }
   0xd LB: > { %s4163_s17 = smov [#allocation8]   ;;  %s4290_s19 = sadd.s32 4294967295, %s4161_s16   ;;  %s4161_s16 = sphi %s4275_s16, %s4870_s16   ;;  %s4157_s15 = sphi %s4273_s15, %s4869_s15   ;;  %s4153_s30 = sphi %s4271_s30, %s4868_s30   ;;  %s4149_s29 = sphi %s4269_s29, %s4867_s29  }
   0xe   : > { %s385_s18 = sshll.u32 %s4163_s17, 4  ;;  %p2996_p0 = scmp.ge.s32.totalorder %s4161_s16, 1  ;;  %s386_s18 = int_to_ptr.vmem [resolvable:$true] %s385_s18 }
   0xf   : > { %p4830_p1 = scmp.eq.s32.totalorder %s4290_s19, 0  ;;  %p361_p2 = scmp.lt.s32.totalorder %s4161_s16, 3 }
  0x10   : > { %s4164_s21 = smov [#allocation5]   ;;  %s4165_s23 = smov [#allocation10]  }
  0x11   : > { %p4296_p4 = pnand %p2996_p0, %p361_p2  ;;  %s374_s22 = sshll.u32 %s4164_s21, 4  ;;  %s375_s22 = int_to_ptr.vmem [resolvable:$true] %s374_s22 }
  0x12   : > { %s396_s24 = sshll.u32 %s4165_s23, 4  ;;  %s4166_s26 = smov [#allocation11]   ;;  %s4308_s24 = int_to_ptr.vmem [resolvable:$true] %s396_s24 }
  0x13   : > { %s4838_s20 = scalar_select %p4296_p4, 1, 0 }
  0x14   : > { %p3323_p5 = pneg %p4296_p4  ;;  %s4310_s27 = sshll.u32 %s4166_s26, 4  ;;  %s411_s27 = int_to_ptr.vmem [resolvable:$true] %s4310_s27 }
  0x15   : > { %s3764_s17 = scalar_lea.vmem %s386_s18, 128  ;;  %p3772_p11 = scmp.lt.s32.totalorder %s386_s18, %s386_s18 }
  0x16   : > { %p4304_p6 = pnand %p3323_p5, %p4830_p1  ;;  %p3765_p8 = scmp.ne.s32.totalorder %s386_s18, %s3764_s17 }
  0x17   : > { %p3773_p12 = scmp.lt.s32.totalorder %s3764_s17, %s3764_s17 }
  0x18   : > { %p4314_p7 = pneg %p4304_p6 }
  0x19   : > { %p3774_p13 = por %p3773_p12, %p3772_p11 }
  0x1a   : > { %p3767_p9 = pnand %p3765_p8, %p4314_p7 }
  0x1c   : > { %p3768_p10 = pneg %p3767_p9 }
  0x1e   : > { %p3775_p0 = pnand %p3774_p13, %p3768_p10 }
  0x20   : > { %3778 = shalt.err (!%p3775_p0)
}
  0x21   : > { %s4841_s1 = sld [smem:[#allocation36_spill]]  ;;  %s3790_s26 = scalar_lea.vmem %s375_s22, 16 }
  0x22   : > { %p3791_p2 = scmp.ne.s32.totalorder %s375_s22, %s3790_s26  ;;  %s3797_s14 = scalar_lea.vmem %s375_s22, 32 }
  0x23   : > { %p3798_p8 = scmp.lt.s32.totalorder %s375_s22, %s375_s22  ;;  %p3799_p9 = scmp.lt.s32.totalorder %s3797_s14, %s3790_s26 }
  0x24   : > { %p3793_p5 = pnand %p3791_p2, %p4314_p7 }
  0x25   : > { %p3800_p1 = por %p3799_p9, %p3798_p8 }
  0x26   : > { %p3794_p3 = pneg %p3793_p5 }
  0x27   : > { %3329 = dma.hbm_to_vmem [thread:$0]  (!%p4304_p6), %s4841_s1, 128, %s386_s18, [#allocation9]  }
  0x28   : > { %p3801_p4 = pnand %p3800_p1, %p3794_p3 }
  0x2a   : > { %3804 = shalt.err (!%p3801_p4)
}
  0x2b   : > { %s4842_s0 = sld [smem:[#allocation35_spill]]  ;;  %s3816_s18 = scalar_lea.vmem %s4308_s24, 16 }
  0x2c   : > { %p3817_p10 = scmp.ne.s32.totalorder %s4308_s24, %s3816_s18  ;;  %s3823_s14 = scalar_lea.vmem %s4308_s24, 32 }
  0x2d   : > { %p3824_p1 = scmp.lt.s32.totalorder %s4308_s24, %s4308_s24  ;;  %p3825_p3 = scmp.lt.s32.totalorder %s3823_s14, %s3816_s18 }
  0x2e   : > { %p3819_p11 = pnand %p3817_p10, %p4314_p7 }
  0x2f   : > { %p3826_p4 = por %p3825_p3, %p3824_p1 }
  0x30   : > { %p3820_p12 = pneg %p3819_p11 }
  0x31   : > { %3326 = dma.hbm_to_vmem [thread:$0]  (!%p4304_p6), %s4842_s0, 16, %s375_s22, [#allocation6]  }
  0x32   : > { %p3827_p13 = pnand %p3826_p4, %p3820_p12 }
  0x34   : > { %3830 = shalt.err (!%p3827_p13)
}
  0x35   : > { %3332 = dma.hbm_to_vmem [thread:$0]  (!%p4304_p6), %s4817_s2, 16, %s4308_s24, [#allocation9]  }
  0x36   : > { %s4167_s22 = smov [#allocation16]   ;;  %s3842_s26 = scalar_lea.vmem %s411_s27, 16 }
  0x37   : > { %s445_s23 = sshll.u32 %s4167_s22, 4  ;;  %p3843_p0 = scmp.ne.s32.totalorder %s411_s27, %s3842_s26  ;;  %s446_s23 = int_to_ptr.vmem [resolvable:$true] %s445_s23 }
  0x38   : > { %s3849_s17 = scalar_lea.vmem %s411_s27, 32  ;;  %p3850_p8 = scmp.lt.s32.totalorder %s411_s27, %s411_s27 }
  0x39   : > { %p3845_p2 = pnand %p3843_p0, %p4314_p7  ;;  %p3851_p9 = scmp.lt.s32.totalorder %s3849_s17, %s3842_s26 }
  0x3b   : > { %p3846_p5 = pneg %p3845_p2  ;;  %p3852_p10 = por %p3851_p9, %p3850_p8 }
  0x3d   : > { %p3853_p11 = pnand %p3852_p10, %p3846_p5 }
  0x3f   : > { %3856 = shalt.err (!%p3853_p11)
}
  0x40   : > { %3335 = dma.hbm_to_vmem [thread:$0]  (!%p4304_p6), %s4819_s4, 16, %s411_s27, [#allocation12]  }
  0x41   : > { %s3868_s24 = scalar_lea.vmem %s446_s23, 64  ;;  %p3876_p4 = scmp.lt.s32.totalorder %s446_s23, %s446_s23 }
  0x42   : > { %p3869_p12 = scmp.ne.s32.totalorder %s446_s23, %s3868_s24  ;;  %p3877_p13 = scmp.lt.s32.totalorder %s3868_s24, %s3868_s24 }
  0x44   : > { %p3871_p1 = pnand %p3869_p12, %p4314_p7  ;;  %p3878_p0 = por %p3877_p13, %p3876_p4 }
  0x46   : > { %p3872_p3 = pneg %p3871_p1 }
  0x48   : > { %p3879_p2 = pnand %p3878_p0, %p3872_p3 }
  0x4a   : > { %3882 = shalt.err (!%p3879_p2)
}
  0x4b   : > { %3344 = dma.hbm_to_vmem [thread:$0]  (!%p4304_p6), %s4824_s9, 64, %s446_s23, [#allocation17]  }
  0x4c   : > { %s4168_s22 = smov [#allocation19]   ;;  %s4169_s26 = smov [#allocation14]  }
  0x4d   : > { %s469_s27 = sshll.u32 %s4168_s22, 4  ;;  %s421_s17 = sshll.u32 %s4169_s26, 4  ;;  %s470_s27 = int_to_ptr.vmem [resolvable:$true] %s469_s27  ;;  %s422_s17 = int_to_ptr.vmem [resolvable:$true] %s421_s17 }
  0x4e   : > { %s3894_s18 = scalar_lea.vmem %s470_s27, 64  ;;  %p3902_p10 = scmp.lt.s32.totalorder %s470_s27, %s470_s27 }
  0x4f   : > { %p3895_p5 = scmp.ne.s32.totalorder %s470_s27, %s3894_s18  ;;  %p3903_p11 = scmp.lt.s32.totalorder %s3894_s18, %s3894_s18 }
  0x51   : > { %p3897_p8 = pnand %p3895_p5, %p4314_p7  ;;  %p3904_p12 = por %p3903_p11, %p3902_p10 }
  0x53   : > { %p3898_p9 = pneg %p3897_p8 }
  0x55   : > { %p3905_p1 = pnand %p3904_p12, %p3898_p9 }
  0x57   : > { %3908 = shalt.err (!%p3905_p1)
}
  0x58   : > { %3350 = dma.hbm_to_vmem [thread:$0]  (!%p4304_p6), %s4826_s11, 64, %s470_s27, [#allocation20]  }
  0x59   : > { %s3920_s23 = scalar_lea.vmem %s422_s17, 64  ;;  %p3928_p0 = scmp.lt.s32.totalorder %s422_s17, %s422_s17 }
  0x5a   : > { %p3921_p3 = scmp.ne.s32.totalorder %s422_s17, %s3920_s23  ;;  %p3929_p2 = scmp.lt.s32.totalorder %s3920_s23, %s3920_s23 }
  0x5c   : > { %p3923_p4 = pnand %p3921_p3, %p4314_p7  ;;  %p3930_p5 = por %p3929_p2, %p3928_p0 }
  0x5e   : > { %p3924_p13 = pneg %p3923_p4 }
  0x60   : > { %p3931_p8 = pnand %p3930_p5, %p3924_p13 }
  0x62   : > { %3934 = shalt.err (!%p3931_p8)
}
  0x63   : > { %3338 = dma.hbm_to_vmem [thread:$0]  (!%p4304_p6), %s4822_s7, 64, %s422_s17, [#allocation9]  }
  0x64   : > { %s4170_s22 = smov [#allocation15]  }
  0x65   : > { %s431_s27 = sshll.u32 %s4170_s22, 4  ;;  %s432_s27 = int_to_ptr.vmem [resolvable:$true] %s431_s27 }
  0x66   : > { %s3946_s26 = scalar_lea.vmem %s432_s27, 2048  ;;  %p3954_p12 = scmp.lt.s32.totalorder %s432_s27, %s432_s27 }
  0x67   : > { %p3947_p9 = scmp.ne.s32.totalorder %s432_s27, %s3946_s26  ;;  %p3955_p1 = scmp.lt.s32.totalorder %s3946_s26, %s3946_s26 }
  0x69   : > { %p3949_p10 = pnand %p3947_p9, %p4314_p7  ;;  %p3956_p3 = por %p3955_p1, %p3954_p12 }
  0x6b   : > { %p3950_p11 = pneg %p3949_p10 }
  0x6d   : > { %p3957_p4 = pnand %p3956_p3, %p3950_p11 }
  0x6f   : > { %3960 = shalt.err (!%p3957_p4)
}
  0x70   : > { %s4171_s18 = smov 256   ;;  %s4172_s14 = smov 16  }
  0x71   : > { %3341 = dma.hbm_to_vmem [thread:$0]  (!%p4304_p6), %s4823_s8, 2048, %s432_s27, [#allocation12], %s4171_s18, %s4171_s18, %s4172_s14  }
  0x72   : > { %s4173_s23 = smov [#allocation18]   ;;  %s4174_s21 = smov [#allocation21]  }
  0x73   : > { %s455_s3 = sshll.u32 %s4173_s23, 4  ;;  %s479_s22 = sshll.u32 %s4174_s21, 4  ;;  %s456_s3 = int_to_ptr.vmem [resolvable:$true] %s455_s3  ;;  %s480_s22 = int_to_ptr.vmem [resolvable:$true] %s479_s22 }
  0x74   : > { %s3972_s0 = scalar_lea.vmem %s456_s3, 2048  ;;  %p3980_p5 = scmp.lt.s32.totalorder %s456_s3, %s456_s3 }
  0x75   : > { %p3973_p13 = scmp.ne.s32.totalorder %s456_s3, %s3972_s0  ;;  %p3981_p8 = scmp.lt.s32.totalorder %s3972_s0, %s3972_s0 }
  0x77   : > { %p3975_p0 = pnand %p3973_p13, %p4314_p7  ;;  %p3982_p9 = por %p3981_p8, %p3980_p5 }
  0x79   : > { %p3976_p2 = pneg %p3975_p0 }
  0x7b   : > { %p3983_p10 = pnand %p3982_p9, %p3976_p2 }
  0x7d   : > { %3986 = shalt.err (!%p3983_p10)
}
  0x7e   : > { %3347 = dma.hbm_to_vmem [thread:$0]  (!%p4304_p6), %s4825_s10, 2048, %s456_s3, [#allocation17], %s4171_s18, %s4171_s18, %s4172_s14  }
  0x7f   : > { %s3998_s24 = scalar_lea.vmem %s480_s22, 4096  ;;  %p4006_p3 = scmp.lt.s32.totalorder %s480_s22, %s480_s22 }
  0x80   : > { %p3999_p11 = scmp.ne.s32.totalorder %s480_s22, %s3998_s24  ;;  %p4007_p4 = scmp.lt.s32.totalorder %s3998_s24, %s3998_s24 }
  0x82   : > { %p4001_p12 = pnand %p3999_p11, %p4314_p7  ;;  %p4008_p13 = por %p4007_p4, %p4006_p3 }
  0x84   : > { %p4002_p1 = pneg %p4001_p12 }
  0x86   : > { %p4009_p0 = pnand %p4008_p13, %p4002_p1 }
  0x88   : > { %4012 = shalt.err (!%p4009_p0)
}
  0x89   : > { %s4175_s0 = smov 512   ;;  %s4176_s17 = smov 32  }
  0x8a   : > { %3353 = dma.hbm_to_vmem [thread:$0]  (!%p4304_p6), %s4827_s12, 4096, %s480_s22, [#allocation20], %s4175_s0, %s4175_s0, %s4176_s17  }
  0x8b   : > { %s4177_s18 = smov [#allocation22]  }
  0x8c   : > { %s493_s14 = sshll.u32 %s4177_s18, 4  ;;  %s494_s14 = int_to_ptr.vmem [resolvable:$true] %s493_s14 }
  0x8d   : > { %s4024_s3 = scalar_lea.vmem %s494_s14, 64  ;;  %p4032_p9 = scmp.lt.s32.totalorder %s494_s14, %s494_s14 }
  0x8e   : > { %p4025_p2 = scmp.ne.s32.totalorder %s494_s14, %s4024_s3  ;;  %p4033_p10 = scmp.lt.s32.totalorder %s4024_s3, %s4024_s3 }
  0x90   : > { %p4027_p5 = pnand %p4025_p2, %p4314_p7  ;;  %p4034_p11 = por %p4033_p10, %p4032_p9 }
  0x92   : > { %p4028_p8 = pneg %p4027_p5 }
  0x94   : > { %p4035_p12 = pnand %p4034_p11, %p4028_p8 }
  0x96   : > { %4038 = shalt.err (!%p4035_p12)
}
  0x97   : > { %3356 = dma.hbm_to_vmem [thread:$0]  (!%p4304_p6), %s4828_s13, 64, %s494_s14, [#allocation23]  }
  0x98   : > { %s4403_s28 = sadd.s32 1, %s4161_s16   ;;  %s169_s22 = sadd.s32 1, %s4157_s15 }
  0x99   : > { %s166_s25 = ssub.s32 %s4161_s16, %s4403_s28  ;;  %p176_p1 = scmp.ne.s32.totalorder %s4157_s15, %s4153_s30 }
  0x9a   : > { %p167_p7 = scmp.eq.s32.totalorder %s166_s25, 0  ;;  %p177_p3 = scmp.eq.s32.totalorder %s4161_s16, 0 }
  0x9b   : > { %p182_p4 = scmp.ne.s32.totalorder %s4153_s30, %s4149_s29  ;;  %p4843_p0 = scmp.eq.s32.totalorder %s4290_s19, 0 }
  0x9c   : > { %s4414_s24 = scalar_select %p167_p7, %s4157_s15, %s169_s22  }
  0x9d   : > { %p178_p13 = por %p177_p3, %p176_p1  ;;  %p4418_p2 = por %p4843_p0, %p182_p4 }
  0x9e   : > { %p3372_p5 = scmp.lt.s32.totalorder %s4161_s16, 2  ;;  %s513_s17 = sand.u32 1, %s4161_s16  }
  0x9f   : > { %s4844_s0 = scalar_select %p4418_p2, 1, 0 }
  0xa0   : > { %s515_s23 = sand.u32 1, %s4157_s15   ;;  %p4425_p6 = pnand %p3372_p5, %p178_p13 }
  0xa1   : > { %s3271_s21 = smul.u32 1536, %s515_s23  ;;  %s4437_s22 = scalar_lea.sflag [#allocation6], %s513_s17 }
  0xa2   : > { %s3235_s14 = smul.u32 24576, %s4161_s16  ;;  %p4041_p9 = pneg %p4425_p6 }
  0xa3   : > { %s517_s27 = scalar_lea.vmem [#allocation13], %s3271_s21 }
  0xa4   : > { %s4433_s26 = scalar_lea.hbm %s4821_s6, %s3235_s14  ;;  %s525_s25 = sshll.u32 %s517_s27, 4  ;;  %s4435_s25 = int_to_ptr.vmem [resolvable:$true] %s525_s25 }
  0xa5   : > { %s4039_s23 = scalar_lea.hbm %s4433_s26, 24576  ;;  %s4044_s14 = scalar_lea.hbm %s4821_s6, 49152 }
  0xa6   : > { %p4040_p8 = scmp.ne.s32.totalorder %s4433_s26, %s4039_s23  ;;  %p4045_p12 = scmp.lt.s32.totalorder %s4433_s26, %s4821_s6 }
  0xa7   : > { %p4046_p7 = scmp.lt.s32.totalorder %s4044_s14, %s4039_s23 }
  0xa8   : > { %p4042_p10 = pnand %p4041_p9, %p4040_p8 }
  0xa9   : > { %p4047_p1 = por %p4046_p7, %p4045_p12 }
  0xaa   : > { %p4043_p11 = pneg %p4042_p10 }
  0xac   : > { %p4048_p3 = pnand %p4047_p1, %p4043_p11 }
  0xae   : > { %4051 = shalt.err (!%p4048_p3)
}
  0xaf   : > { %s4052_s17 = scalar_lea.vmem %s4435_s25, 24576  ;;  %s4178_s21 = smov [#allocation13]  }
  0xb0   : > { %p4053_p4 = scmp.ne.s32.totalorder %s4435_s25, %s4052_s17  ;;  %s4057_s27 = sshll.u32 %s4178_s21, 4  ;;  %s4058_s27 = int_to_ptr.vmem [resolvable:$false] %s4057_s27 }
  0xb1   : > { %s4059_s1 = scalar_lea.vmem %s4058_s27, 49152  ;;  %p4060_p5 = scmp.lt.s32.totalorder %s4435_s25, %s4058_s27 }
  0xb2   : > { %p4055_p13 = pnand %p4053_p4, %p4041_p9  ;;  %p4061_p8 = scmp.lt.s32.totalorder %s4059_s1, %s4052_s17 }
  0xb4   : > { %p4056_p0 = pneg %p4055_p13  ;;  %p4062_p10 = por %p4061_p8, %p4060_p5 }
  0xb6   : > { %p4063_p2 = pnand %p4062_p10, %p4056_p0 }
  0xb8   : > { %4066 = shalt.err (!%p4063_p2)
}
  0xb9   : > { %s4179_s23 = smov 128   ;;  %s4180_s16 = smov 8  }
  0xba   : > { %3360 = dma.hbm_to_vmem [thread:$0]  (!%p4425_p6), %s4433_s26, 24576, %s4435_s25, %s4437_s22, %s4179_s23, %s4179_s23, %s4180_s16  }
  0xbb   : > { %p4846_p9 = scmp.ne.s32.totalorder %s4838_s20, 0 }
  0xbc   : > { %p4847_p11 = scmp.eq.s32.totalorder (!%p4846_p9), %s4290_s19, 0 }
  0xbd   : > { %537 = sbr.rel (%p4846_p9) target bundleno = 2696 (0xa88), region = 76 }
  0xc2   : > { %4108 = dma.done.wait (%p4847_p11), [#allocation6], 16   ;;  %p4848_p12 = pmov %p4847_p11 }
  0xc3   : > { %p4849_p7 = pmov %p4847_p11 }
  0xc4   : > { %4110 = vsyncadd (%p4848_p12), [#allocation6], 4294967280 }
  0xc5   : > { %4112 = dma.done.wait (%p4849_p7), [#allocation9], 144   ;;  %p4850_p2 = pmov %p4849_p7 }
  0xc7   : > { %4114 = vsyncadd (%p4850_p2), [#allocation9], 4294967152  ;;  %p4851_p1 = pmov %p4850_p2 }
  0xc9   : > { %4116 = dma.done.wait (%p4851_p1), [#allocation12], 16   ;;  %p4852_p6 = pmov %p4851_p1 }
  0xca   : > { %s555_s20 = sand.u32 1, %s4290_s19   ;;  %s557_s18 = sand.u32 1, %s4153_s30  }
  0xcb   : > { %4118 = vsyncadd (%p4852_p6), [#allocation12], 4294967280  ;;  %s3272_s26 = smul.u32 1536, %s557_s18  ;;  %s556_s25 = scalar_lea.sflag [#allocation6], %s555_s20 }
  0xcc   : > { %p4853_p3 = scmp.ne.s32.totalorder %s4844_s0, 0 }
  0xcd   : > { %s4474_s22 = scalar_lea.vmem [#allocation13], %s3272_s26 }
  0xce   : > { %4120 = dma.done.wait (%p4853_p3), %s556_s25, 24576  }
  0xcf   : > { %4122 = vsyncadd (%p4853_p3), %s556_s25, 4294942720  ;;  %p4854_p4 = pmov %p4851_p1 }
  0xd0   : > { %p4855_p13 = pmov %p4851_p1 }
  0xd1   : > { %4124 = dma.done.wait (%p4854_p4), [#allocation9], 64  }
  0xd2   : > { %4126 = vsyncadd (%p4855_p13), [#allocation9], 4294967232  ;;  %p4856_p0 = pmov %p4851_p1 }
  0xd4   : > { %4128 = dma.done.wait (%p4856_p0), [#allocation12], 2048   ;;  %p4857_p5 = pmov %p4856_p0 }
  0xd5   : > { %p4858_p8 = pmov %p4856_p0 }
  0xd6   : > { %4130 = vsyncadd (%p4857_p5), [#allocation12], 4294965248 }
  0xd7   : > { %4132 = dma.done.wait (%p4858_p8), [#allocation17], 2112   ;;  %p4859_p10 = pmov %p4856_p0 }
  0xd8   : > { %p4860_p9 = pmov %p4856_p0 }
  0xd9   : > { %4134 = vsyncadd (%p4859_p10), [#allocation17], 4294965184 }
  0xda   : > { %4136 = dma.done.wait (%p4860_p9), [#allocation20], 4160   ;;  %p4861_p11 = pmov %p4856_p0 }
  0xdb   : > { %p4862_p12 = pmov %p4856_p0 }
  0xdc   : > { %4138 = vsyncadd (%p4861_p11), [#allocation20], 4294963136 }
  0xdd   : > { %4140 = dma.done.wait (%p4862_p12), [#allocation23], 64   ;;  %p4863_p7 = pmov %p4856_p0 }
  0xde   : > { %s632_s0 = smul.u32 12, %s4290_s19  ;;  %p4864_p1 = scmp.ne.s32.totalorder %s4290_s19, 0 }
  0xdf   : > { %4142 = vsyncadd (%p4863_p7), [#allocation23], 4294967232  ;;  %s4865_s1 = sld [smem:[#allocation37_spill]] (!%p4864_p1) }
  0xe0   : > { %p633_p2 = scmp.lt.s32.totalorder %s632_s0, 23  ;;  %642 = sbr.rel (%p4864_p1) target bundleno = 1076 (0x434), region = 128 }
  0xe2   : > { %s4872_s0 = smov (!%p633_p2, %s632_s0), 23 }
  0xe3   : > { %s3023_s14 = sshll.u32 %s4872_s0, 3 }
  0xe4   : > { %s4504_s17 = scalar_lea.vmem %s4820_s5, %s3023_s14 }
  0xe5   : > { %v646_v0 = vld [vmem:[#allocation8] sm:$0xff]  ;;  %v645_v1 = vld [vmem:[#allocation5] sm:$0x1]  ;;  %vm648_vm0 = vcmask 64512   ;;  %v4181_v2 = vmov 0.0   ;;  %vm4182_vm1 = vmmov 0  }
  0xe6   : > { %643 = vst [vmem:[#allocation2] sm:$0xff] %v4181_v2  ;;  %644 = vst [vmem:[#allocation2 + $0x8] sm:$0xff] %v4181_v2  ;;  %3247 = vmatprep.subr.mxu0 %v4181_v2  ;;  %3249 = vmatprep.mubr.msk.f32.mxu0 %vm4182_vm1, %v4181_v2  ;;  %v730_v3 = vld [vmem:[%s4865_s1 + $0x38] sm:$0xff]  ;;  %v729_v4 = vld [vmem:[%s4865_s1 + $0x30] sm:$0xff]  ;;  %vm732_vm2 = vcmask 523264   ;;  %vm806_vm3 = vcmask 24576  }
  0xe7   : > { %3248 = vmatpush3.msra.mxu0 %v646_v0  ;;  %3252 = vmatprep.subr.mxu1 %v4181_v2  ;;  %v728_v5 = vld [vmem:[%s4865_s1 + $0x28] sm:$0xff]  ;;  %v727_v6 = vld [vmem:[%s4865_s1 + $0x20] sm:$0xff]  ;;  %v726_v7 = vld [vmem:[%s4865_s1 + $0x18] sm:$0xff]  ;;  %v4183_v26 = vmov 2   ;;  %v4184_v27 = vmov 0   ;;  %v4185_v31 = vmov 1  }
  0xe8   : > { %3250 = vmatmul.mubr.msk.f32.vlgmr.msra.gmra.mxu0 %vm648_vm0, %v645_v1  ;;  %3253 = vmatpush3.msra.mxu1 %v730_v3  ;;  %v725_v8 = vld [vmem:[%s4865_s1 + $0x10] sm:$0xff]  ;;  %v724_v9 = vld [vmem:[%s4865_s1 + $0x8] sm:$0xff]  ;;  %v723_v10 = vld [vmem:[%s4865_s1] sm:$0xff]  ;;  %v4186_v32 = vmov 3   ;;  %vm847_vm4 = vcmask 516096  }
  0xe9   : > { %3254 = vmatprep.subr.mxu1 %v4181_v2  ;;  %3268 = vmatprep.mubr.msk.f32.mxu1 %vm4182_vm1, %v4181_v2  ;;  %v647_v11 = vld [vmem:[#allocation10] sm:$0x1]  ;;  %v731_v16 = vld [vmem:[#allocation11] sm:$0x1]  ;;  %v819_v34 = vld [vmem:[#allocation14] sm:$0x1] }
  0xea   : > { %3255 = vmatpush3.msra.mxu1 %v729_v4  ;;  %3450 = vset.pattern.permute.xlu0 %v4183_v26  ;;  %v849_v35 = vld [vmem:[#allocation16] sm:$0x1]  ;;  %v833_v36 = vld [vmem:[#allocation14 + $0x2] sm:$0x1]  ;;  %v861_v37 = vld [vmem:[#allocation19] sm:$0x1] }
  0xeb   : > { %3256 = vmatprep.subr.mxu1 %v4181_v2  ;;  %3448 = vset.pattern.permute.xlu1 %v4184_v27  ;;  %v873_v38 = vld [vmem:[#allocation22] sm:$0x1]  ;;  %v826_v39 = vld [vmem:[#allocation14 + $0x1] sm:$0x1]  ;;  %v851_v40 = vld [vmem:[#allocation16 + $0x1] sm:$0x1] }
  0xec   : > { %3257 = vmatpush3.msra.mxu1 %v728_v5  ;;  %v863_v41 = vld [vmem:[#allocation19 + $0x1] sm:$0x1]  ;;  %v875_v42 = vld [vmem:[#allocation22 + $0x1] sm:$0x1]  ;;  %v854_v43 = vld [vmem:[#allocation16 + $0x2] sm:$0x1] }
  0xed   : > { %3258 = vmatprep.subr.mxu1 %v4181_v2  ;;  %v866_v44 = vld [vmem:[#allocation19 + $0x2] sm:$0x1]  ;;  %v878_v45 = vld [vmem:[#allocation22 + $0x2] sm:$0x1]  ;;  %v840_v60 = vld [vmem:[#allocation14 + $0x3] sm:$0x1] }
  0xee   : > { %3259 = vmatpush3.msra.mxu1 %v727_v6  ;;  %v857_v1 = vld [vmem:[#allocation16 + $0x3] sm:$0x1]  ;;  %v881_v3 = vld [vmem:[#allocation22 + $0x3] sm:$0x1] }
  0xef   : > { %3260 = vmatprep.subr.mxu1 %v4181_v2 }
  0xf0   : > { %3261 = vmatpush3.msra.mxu1 %v726_v7 }
  0xf1   : > { %3262 = vmatprep.subr.mxu1 %v4181_v2 }
  0xf2   : > { %3263 = vmatpush3.msra.mxu1 %v725_v8 }
  0xf3   : > { %3264 = vmatprep.subr.mxu1 %v4181_v2 }
  0xf4   : > { %3265 = vmatpush3.msra.mxu1 %v724_v9 }
  0xf5   : > { %3266 = vmatprep.subr.mxu1 %v4181_v2  ;;  %v869_v2 = vld [vmem:[#allocation19 + $0x3] sm:$0x1] }
  0xf6   : > { %3267 = vmatpush3.msra.mxu1 %v723_v10 }
 0x1a8   : > { %v718_v12 = vpop.f32.mrf.mxu0 }
 0x1a9   : > { %v719_v13 = vadd.f32 %v718_v12, %v647_v11 }
 0x1aa   : > { %v3251_v14 = vpop.f32.mrf.mxu0 }
 0x1ab   : > { %v722_v15 = vmax.f32 %v719_v13, 0.0 }
 0x1ad   : > { %3269 = vmatmul.mubr.msk.f32.vlgmr.msra.gmra.mxu1 %vm732_vm2, %v722_v15 }
 0x26d   : > { %v802_v17 = vpop.f32.mrf.mxu1 }
 0x26e   : > { %v803_v18 = vadd.f32 %v802_v17, %v731_v16 }
 0x26f   : > { %v3270_v19 = vpop.f32.mrf.mxu1 }
 0x270   : > { %v807_v20 = vsel %vm806_vm3, %v803_v18, -inf }
 0x271   : > { %808 = vmax.xlane.f32.xlu0 %v807_v20 }
 0x2fa   : > { %v809_v21 = vpop.xlane.xlu0 %808 }
 0x2fb   : > { %v810_v22 = vsub.f32 %v803_v18, %v809_v21 }
 0x2fd   : > { %v811_v23 = vmul.f32 1.442695, %v810_v22 }
 0x2ff   : > { %3453 = vpow2.f32 %v811_v23 }
 0x30c   : > { %v3454_v24 = vpop.eup %3453 }
 0x30d   : > { %v813_v25 = vsel %vm806_vm3, %v3454_v24, 0.0 }
 0x30e   : > { %814 = vadd.xlane.f32.xlu0 %v813_v25 }
 0x397   : > { %v815_v28 = vpop.xlane.xlu0 %814 }
 0x398   : > { %3455 = vrcp.f32 %v815_v28 }
 0x3a5   : > { %v3456_v29 = vpop.eup %3455 }
 0x3a6   : > { %v817_v30 = vmul.f32 %v3456_v29, %v3454_v24 }
 0x3a8   : > { %835 = vperm.xlu0 %3450, %v817_v30   ;;  %818 = vst.msk [vmem:[#allocation3] sm:$0x1] %vm806_vm3, %v817_v30  ;;  %822 = vperm.xlu1 %3448, %v817_v30  }
 0x3ac   : > { %3449 = vset.pattern.permute.xlu1 %v4185_v31  ;;  %3452 = vset.pattern.permute.xlu0 %v4186_v32 }
 0x3ad   : > { %828 = vperm.xlu1 %3449, %v817_v30  }
 0x3b1   : > { %3451 = vset.pattern.permute.xlu1 %v4186_v32 }
 0x3b2   : > { %842 = vperm.xlu1 %3451, %v817_v30  }
 0x423   : > { %v823_v33 = vpop.permute.xlu1 %822  ;;  %v836_v46 = vpop.permute.xlu0 %835 }
 0x424   : > { %v825_v47 = vmul.f32 %v823_v33, %v819_v34  ;;  %v850_v48 = vmul.f32 %v849_v35, %v823_v33  ;;  %v862_v49 = vmul.f32 %v861_v37, %v823_v33  ;;  %v874_v50 = vmul.f32 %v873_v38, %v823_v33 }
 0x425   : > { %v838_v56 = vmul.f32 %v836_v46, %v833_v36  ;;  %v855_v57 = vmul.f32 %v854_v43, %v836_v46  ;;  %v867_v58 = vmul.f32 %v866_v44, %v836_v46  ;;  %v879_v59 = vmul.f32 %v878_v45, %v836_v46 }
 0x428   : > { %v829_v51 = vpop.permute.xlu1 %828 }
 0x429   : > { %v831_v52 = vmul.f32 %v829_v51, %v826_v39  ;;  %v852_v53 = vmul.f32 %v851_v40, %v829_v51  ;;  %v864_v54 = vmul.f32 %v863_v41, %v829_v51  ;;  %v876_v55 = vmul.f32 %v875_v42, %v829_v51 }
 0x42b   : > { %v832_v61 = vadd.f32 %v831_v52, %v825_v47  ;;  %v853_v62 = vadd.f32 %v852_v53, %v850_v48  ;;  %v865_v63 = vadd.f32 %v864_v54, %v862_v49  ;;  %v877_v0 = vadd.f32 %v876_v55, %v874_v50 }
 0x42d   : > { %v839_v4 = vadd.f32 %v838_v56, %v832_v61  ;;  %v856_v5 = vadd.f32 %v855_v57, %v853_v62  ;;  %v868_v6 = vadd.f32 %v867_v58, %v865_v63  ;;  %v880_v7 = vadd.f32 %v879_v59, %v877_v0  ;;  %v843_v8 = vpop.permute.xlu1 %842 }
 0x42e   : > { %v845_v9 = vmul.f32 %v843_v8, %v840_v60  ;;  %v858_v10 = vmul.f32 %v857_v1, %v843_v8  ;;  %v870_v11 = vmul.f32 %v869_v2, %v843_v8  ;;  %v882_v12 = vmul.f32 %v881_v3, %v843_v8 }
 0x430   : > { %v846_v13 = vadd.f32 %v845_v9, %v839_v4  ;;  %v859_v14 = vadd.f32 %v858_v10, %v856_v5  ;;  %v871_v15 = vadd.f32 %v870_v11, %v868_v6  ;;  %v883_v16 = vadd.f32 %v882_v12, %v880_v7 }
 0x432   : > { %848 = vst.msk [vmem:[#allocation4] sm:$0x1] %vm847_vm4, %v846_v13  ;;  %860 = vst.msk [vmem:[#allocation4 + $0x1] sm:$0x1] %vm847_vm4, %v859_v14 }
 0x433   : > { %872 = vst.msk [vmem:[#allocation4 + $0x2] sm:$0x1] %vm847_vm4, %v871_v15  ;;  %884 = vst [vmem:[#allocation4 + $0x3] sm:$0x1] %v883_v16 }
 0x434 PF: > { %v3457_v17 = vld [vmem:[%s4474_s22 + $0x74] ss:$8 sps:$4 sm:$0xff]   ;;  %v3461_v19 = vld [vmem:[%s4474_s22 + $0x70] ss:$8 sps:$4 sm:$0xff]   ;;  %v3463_v21 = vld [vmem:[%s4474_s22 + $0x64] ss:$8 sps:$4 sm:$0xff]  }
 0x435   : > { %v3459_v18 = vld [vmem:[%s4474_s22 + $0x174] ss:$8 sps:$4 sm:$0xff]   ;;  %2063 = vmatprep.subr.bf16.mxu0 %v3457_v17  ;;  %v3462_v20 = vld [vmem:[%s4474_s22 + $0x170] ss:$8 sps:$4 sm:$0xff]   ;;  %v3465_v22 = vld [vmem:[%s4474_s22 + $0x164] ss:$8 sps:$4 sm:$0xff]  }
 0x436   : > { %2104 = vmatprep.subr.bf16.mxu1 %v3459_v18  ;;  %2064 = vmatpush1.bf16.msra.mxu0 %v3461_v19  ;;  %v3467_v23 = vld [vmem:[%s4474_s22 + $0x60] ss:$8 sps:$4 sm:$0xff]   ;;  %v3469_v25 = vld [vmem:[%s4474_s22 + $0x54] ss:$8 sps:$4 sm:$0xff]   ;;  %v3473_v27 = vld [vmem:[%s4474_s22 + $0x50] ss:$8 sps:$4 sm:$0xff]  }
 0x437   : > { %2105 = vmatpush1.bf16.msra.mxu1 %v3462_v20  ;;  %2065 = vmatprep.subr.bf16.mxu0 %v3463_v21  ;;  %v3468_v24 = vld [vmem:[%s4474_s22 + $0x160] ss:$8 sps:$4 sm:$0xff]   ;;  %v3471_v26 = vld [vmem:[%s4474_s22 + $0x154] ss:$8 sps:$4 sm:$0xff]   ;;  %v3474_v28 = vld [vmem:[%s4474_s22 + $0x150] ss:$8 sps:$4 sm:$0xff]  }
 0x438   : > { %2106 = vmatprep.subr.bf16.mxu1 %v3465_v22  ;;  %v3475_v29 = vld [vmem:[%s4474_s22 + $0x44] ss:$8 sps:$4 sm:$0xff]   ;;  %v3479_v31 = vld [vmem:[%s4474_s22 + $0x40] ss:$8 sps:$4 sm:$0xff]   ;;  %v3481_v33 = vld [vmem:[%s4474_s22 + $0x34] ss:$8 sps:$4 sm:$0xff]  }
 0x439   : > { %v3477_v30 = vld [vmem:[%s4474_s22 + $0x144] ss:$8 sps:$4 sm:$0xff]   ;;  %v3480_v32 = vld [vmem:[%s4474_s22 + $0x140] ss:$8 sps:$4 sm:$0xff]   ;;  %v3483_v34 = vld [vmem:[%s4474_s22 + $0x134] ss:$8 sps:$4 sm:$0xff]  }
 0x43a   : > { %2066 = vmatpush1.bf16.msra.mxu0 %v3467_v23  ;;  %v3485_v35 = vld [vmem:[%s4474_s22 + $0x30] ss:$8 sps:$4 sm:$0xff]   ;;  %v3487_v37 = vld [vmem:[%s4474_s22 + $0x24] ss:$8 sps:$4 sm:$0xff]   ;;  %v3491_v39 = vld [vmem:[%s4474_s22 + $0x20] ss:$8 sps:$4 sm:$0xff]  }
 0x43b   : > { %2107 = vmatpush1.bf16.msra.mxu1 %v3468_v24  ;;  %2067 = vmatprep.subr.bf16.mxu0 %v3469_v25  ;;  %v3486_v36 = vld [vmem:[%s4474_s22 + $0x130] ss:$8 sps:$4 sm:$0xff]   ;;  %v3489_v38 = vld [vmem:[%s4474_s22 + $0x124] ss:$8 sps:$4 sm:$0xff]   ;;  %v3492_v40 = vld [vmem:[%s4474_s22 + $0x120] ss:$8 sps:$4 sm:$0xff]  }
 0x43c   : > { %2108 = vmatprep.subr.bf16.mxu1 %v3471_v26  ;;  %v3493_v41 = vld [vmem:[%s4474_s22 + $0x14] ss:$8 sps:$4 sm:$0xff]   ;;  %v3497_v43 = vld [vmem:[%s4474_s22 + $0x10] ss:$8 sps:$4 sm:$0xff]   ;;  %v3499_v45 = vld [vmem:[%s4474_s22 + $0x4] ss:$8 sps:$4 sm:$0xff]  }
 0x43d   : > { %v3495_v42 = vld [vmem:[%s4474_s22 + $0x114] ss:$8 sps:$4 sm:$0xff]   ;;  %v3498_v44 = vld [vmem:[%s4474_s22 + $0x110] ss:$8 sps:$4 sm:$0xff]   ;;  %v3501_v46 = vld [vmem:[%s4474_s22 + $0x104] ss:$8 sps:$4 sm:$0xff]  }
 0x43e   : > { %2068 = vmatpush1.bf16.msra.mxu0 %v3473_v27  ;;  %v3503_v47 = vld [vmem:[%s4474_s22] ss:$8 sps:$4 sm:$0xff]   ;;  %v3505_v49 = vld [vmem:[%s4474_s22 + $0xf4] ss:$8 sps:$4 sm:$0xff]   ;;  %v3509_v51 = vld [vmem:[%s4474_s22 + $0xf0] ss:$8 sps:$4 sm:$0xff]  }
 0x43f   : > { %2109 = vmatpush1.bf16.msra.mxu1 %v3474_v28  ;;  %2069 = vmatprep.subr.bf16.mxu0 %v3475_v29  ;;  %v3504_v48 = vld [vmem:[%s4474_s22 + $0x100] ss:$8 sps:$4 sm:$0xff]   ;;  %v3507_v50 = vld [vmem:[%s4474_s22 + $0x1f4] ss:$8 sps:$4 sm:$0xff]   ;;  %v3510_v52 = vld [vmem:[%s4474_s22 + $0x1f0] ss:$8 sps:$4 sm:$0xff]  }
 0x440   : > { %2110 = vmatprep.subr.bf16.mxu1 %v3477_v30  ;;  %v3511_v53 = vld [vmem:[%s4474_s22 + $0xe4] ss:$8 sps:$4 sm:$0xff]   ;;  %v3515_v55 = vld [vmem:[%s4474_s22 + $0xe0] ss:$8 sps:$4 sm:$0xff]   ;;  %v3517_v57 = vld [vmem:[%s4474_s22 + $0xd4] ss:$8 sps:$4 sm:$0xff]  }
 0x441   : > { %v3513_v54 = vld [vmem:[%s4474_s22 + $0x1e4] ss:$8 sps:$4 sm:$0xff]   ;;  %v3516_v56 = vld [vmem:[%s4474_s22 + $0x1e0] ss:$8 sps:$4 sm:$0xff]   ;;  %v3519_v58 = vld [vmem:[%s4474_s22 + $0x1d4] ss:$8 sps:$4 sm:$0xff]  }
 0x442   : > { %2070 = vmatpush1.bf16.msra.mxu0 %v3479_v31  ;;  %v3521_v59 = vld [vmem:[%s4474_s22 + $0xd0] ss:$8 sps:$4 sm:$0xff]   ;;  %v3523_v61 = vld [vmem:[%s4474_s22 + $0xc4] ss:$8 sps:$4 sm:$0xff]   ;;  %v3527_v0 = vld [vmem:[%s4474_s22 + $0xc0] ss:$8 sps:$4 sm:$0xff]  }
 0x443   : > { %2111 = vmatpush1.bf16.msra.mxu1 %v3480_v32  ;;  %2071 = vmatprep.subr.bf16.mxu0 %v3481_v33  ;;  %v3522_v60 = vld [vmem:[%s4474_s22 + $0x1d0] ss:$8 sps:$4 sm:$0xff]   ;;  %v3525_v62 = vld [vmem:[%s4474_s22 + $0x1c4] ss:$8 sps:$4 sm:$0xff]   ;;  %v3528_v1 = vld [vmem:[%s4474_s22 + $0x1c0] ss:$8 sps:$4 sm:$0xff]  }
 0x444   : > { %2112 = vmatprep.subr.bf16.mxu1 %v3483_v34  ;;  %v888_v63 = vld [vmem:[%s4504_s17 + $0x8] sm:$0xff]  ;;  %v890_v3 = vld [vmem:[%s4504_s17 + $0x18] sm:$0xff]  ;;  %v887_v21 = vld [vmem:[%s4504_s17] sm:$0xff]  ;;  %p3219_p6 = scmp.ne.s32.totalorder %s4290_s19, 1 }
 0x445   : > { %v900_v2 = vpack.c.bf16 %v888_v63, %v888_v63  ;;  %v3529_v4 = vld [vmem:[%s4474_s22 + $0xb4] ss:$8 sps:$4 sm:$0xff]   ;;  %v902_v5 = vpack.c.bf16 %v890_v3, %v890_v3  ;;  %v3533_v7 = vld [vmem:[%s4474_s22 + $0xb0] ss:$8 sps:$4 sm:$0xff]   ;;  %v3535_v9 = vld [vmem:[%s4474_s22 + $0xa4] ss:$8 sps:$4 sm:$0xff]   ;;  %v899_v25 = vpack.c.bf16 %v887_v21, %v887_v21 }
 0x446   : > { %2072 = vmatpush1.bf16.msra.mxu0 %v3485_v35  ;;  %v3531_v6 = vld [vmem:[%s4474_s22 + $0x1b4] ss:$8 sps:$4 sm:$0xff]   ;;  %v3534_v8 = vld [vmem:[%s4474_s22 + $0x1b0] ss:$8 sps:$4 sm:$0xff]   ;;  %v3537_v10 = vld [vmem:[%s4474_s22 + $0x1a4] ss:$8 sps:$4 sm:$0xff]  }
 0x447   : > { %2113 = vmatpush1.bf16.msra.mxu1 %v3486_v36  ;;  %2073 = vmatprep.subr.bf16.mxu0 %v3487_v37  ;;  %v3539_v11 = vld [vmem:[%s4474_s22 + $0xa0] ss:$8 sps:$4 sm:$0xff]   ;;  %v3541_v13 = vld [vmem:[%s4474_s22 + $0x94] ss:$8 sps:$4 sm:$0xff]   ;;  %v3545_v15 = vld [vmem:[%s4474_s22 + $0x90] ss:$8 sps:$4 sm:$0xff]  }
 0x448   : > { %2114 = vmatprep.subr.bf16.mxu1 %v3489_v38  ;;  %2095 = vmatprep.mubr.bf16.mxu0 %v900_v2  ;;  %v3540_v12 = vld [vmem:[%s4474_s22 + $0x1a0] ss:$8 sps:$4 sm:$0xff]   ;;  %v3543_v14 = vld [vmem:[%s4474_s22 + $0x194] ss:$8 sps:$4 sm:$0xff]   ;;  %v3546_v16 = vld [vmem:[%s4474_s22 + $0x190] ss:$8 sps:$4 sm:$0xff]  }
 0x449   : > { %2136 = vmatprep.mubr.bf16.mxu1 %v902_v5  ;;  %v3547_v17 = vld [vmem:[%s4474_s22 + $0x84] ss:$8 sps:$4 sm:$0xff]   ;;  %v3551_v19 = vld [vmem:[%s4474_s22 + $0x80] ss:$8 sps:$4 sm:$0xff]   ;;  %v3555_v23 = vld [vmem:[%s4474_s22 + $0x274] ss:$8 sps:$4 sm:$0xff]  }
 0x44a   : > { %2074 = vmatpush1.bf16.msra.mxu0 %v3491_v39  ;;  %v3549_v18 = vld [vmem:[%s4474_s22 + $0x184] ss:$8 sps:$4 sm:$0xff]   ;;  %v3552_v20 = vld [vmem:[%s4474_s22 + $0x180] ss:$8 sps:$4 sm:$0xff]   ;;  %v3558_v24 = vld [vmem:[%s4474_s22 + $0x374] ss:$8 sps:$4 sm:$0xff]  }
 0x44b   : > { %2115 = vmatpush1.bf16.msra.mxu1 %v3492_v40  ;;  %2075 = vmatprep.subr.bf16.mxu0 %v3493_v41  ;;  %v889_v22 = vld [vmem:[%s4504_s17 + $0x10] sm:$0xff]  ;;  %v3559_v31 = vld [vmem:[%s4474_s22 + $0x260] ss:$8 sps:$4 sm:$0xff]  }
 0x44c   : > { %2116 = vmatprep.subr.bf16.mxu1 %v3495_v42  ;;  %v901_v26 = vpack.c.bf16 %v889_v22, %v889_v22  ;;  %v3553_v27 = vld [vmem:[%s4474_s22 + $0x270] ss:$8 sps:$4 sm:$0xff]   ;;  %v3561_v29 = vld [vmem:[%s4474_s22 + $0x264] ss:$8 sps:$4 sm:$0xff]   ;;  %v3562_v32 = vld [vmem:[%s4474_s22 + $0x360] ss:$8 sps:$4 sm:$0xff]  }
 0x44d   : > { %v3556_v28 = vld [vmem:[%s4474_s22 + $0x370] ss:$8 sps:$4 sm:$0xff]   ;;  %v3564_v30 = vld [vmem:[%s4474_s22 + $0x364] ss:$8 sps:$4 sm:$0xff]   ;;  %v3567_v33 = vld [vmem:[%s4474_s22 + $0x254] ss:$8 sps:$4 sm:$0xff]  }
 0x44e   : > { %2076 = vmatpush1.bf16.msra.mxu0 %v3497_v43  ;;  %v3570_v34 = vld [vmem:[%s4474_s22 + $0x354] ss:$8 sps:$4 sm:$0xff]   ;;  %v3565_v35 = vld [vmem:[%s4474_s22 + $0x250] ss:$8 sps:$4 sm:$0xff]   ;;  %v3573_v37 = vld [vmem:[%s4474_s22 + $0x244] ss:$8 sps:$4 sm:$0xff]  }
 0x44f   : > { %2117 = vmatpush1.bf16.msra.mxu1 %v3498_v44  ;;  %2077 = vmatprep.subr.bf16.mxu0 %v3499_v45  ;;  %v3568_v36 = vld [vmem:[%s4474_s22 + $0x350] ss:$8 sps:$4 sm:$0xff]   ;;  %v3576_v38 = vld [vmem:[%s4474_s22 + $0x344] ss:$8 sps:$4 sm:$0xff]   ;;  %v3571_v39 = vld [vmem:[%s4474_s22 + $0x240] ss:$8 sps:$4 sm:$0xff]  }
 0x450   : > { %2118 = vmatprep.subr.bf16.mxu1 %v3501_v46  ;;  %v3574_v40 = vld [vmem:[%s4474_s22 + $0x340] ss:$8 sps:$4 sm:$0xff]   ;;  %v3579_v41 = vld [vmem:[%s4474_s22 + $0x234] ss:$8 sps:$4 sm:$0xff]   ;;  %v3577_v43 = vld [vmem:[%s4474_s22 + $0x230] ss:$8 sps:$4 sm:$0xff]  }
 0x451   : > { %v3582_v42 = vld [vmem:[%s4474_s22 + $0x334] ss:$8 sps:$4 sm:$0xff]   ;;  %v3580_v44 = vld [vmem:[%s4474_s22 + $0x330] ss:$8 sps:$4 sm:$0xff]   ;;  %v3585_v45 = vld [vmem:[%s4474_s22 + $0x224] ss:$8 sps:$4 sm:$0xff]  }
 0x452   : > { %2078 = vmatpush1.bf16.msra.mxu0 %v3503_v47  ;;  %v3588_v46 = vld [vmem:[%s4474_s22 + $0x324] ss:$8 sps:$4 sm:$0xff]   ;;  %v3583_v47 = vld [vmem:[%s4474_s22 + $0x220] ss:$8 sps:$4 sm:$0xff]   ;;  %v3601_v63 = vld [vmem:[%s4474_s22 + $0x2f0] ss:$8 sps:$4 sm:$0xff]  }
 0x453   : > { %2119 = vmatpush1.bf16.msra.mxu1 %v3504_v48  ;;  %2079 = vmatprep.subr.bf16.mxu0 %v3505_v49  ;;  %v3586_v48 = vld [vmem:[%s4474_s22 + $0x320] ss:$8 sps:$4 sm:$0xff]   ;;  %v3591_v49 = vld [vmem:[%s4474_s22 + $0x214] ss:$8 sps:$4 sm:$0xff]   ;;  %v3612_v2 = vld [vmem:[%s4474_s22 + $0x3e4] ss:$8 sps:$4 sm:$0xff]  }
 0x454   : > { %2120 = vmatprep.subr.bf16.mxu1 %v3507_v50  ;;  %v3594_v50 = vld [vmem:[%s4474_s22 + $0x314] ss:$8 sps:$4 sm:$0xff]   ;;  %v3607_v3 = vld [vmem:[%s4474_s22 + $0x2e0] ss:$8 sps:$4 sm:$0xff]  }
 0x455   : > { %v3615_v5 = vld [vmem:[%s4474_s22 + $0x2d4] ss:$8 sps:$4 sm:$0xff]  }
 0x456   : > { %2080 = vmatpush2.bf16.msra.mxu0 %v3509_v51  ;;  %v892_v51 = vld [vmem:[%s4504_s17 + $0x28] sm:$0xff]  ;;  %v3639_v21 = vld [vmem:[%s4474_s22 + $0x294] ss:$8 sps:$4 sm:$0xff]  }
 0x457   : > { %2121 = vmatpush2.bf16.msra.mxu1 %v3510_v52  ;;  %2081 = vmatprep.subr.bf16.mxu0 %v3511_v53  ;;  %v3589_v52 = vld [vmem:[%s4474_s22 + $0x210] ss:$8 sps:$4 sm:$0xff]   ;;  %v3642_v22 = vld [vmem:[%s4474_s22 + $0x394] ss:$8 sps:$4 sm:$0xff]  }
 0x458   : > { %2122 = vmatprep.subr.bf16.mxu1 %v3513_v54  ;;  %v3592_v53 = vld [vmem:[%s4474_s22 + $0x310] ss:$8 sps:$4 sm:$0xff]   ;;  %v904_v54 = vpack.c.bf16 %v892_v51, %v892_v51  ;;  %v3667_v51 = vld [vmem:[%s4474_s22 + $0x440] ss:$8 sps:$4 sm:$0xff]  }
 0x45a   : > { %2082 = vmatpush2.bf16.msra.mxu0 %v3515_v55  ;;  %v894_v55 = vld [vmem:[%s4504_s17 + $0x38] sm:$0xff] }
 0x45b   : > { %2123 = vmatpush2.bf16.msra.mxu1 %v3516_v56  ;;  %2083 = vmatprep.subr.bf16.mxu0 %v3517_v57  ;;  %v3597_v56 = vld [vmem:[%s4474_s22 + $0x204] ss:$8 sps:$4 sm:$0xff]   ;;  %v906_v57 = vpack.c.bf16 %v894_v55, %v894_v55  ;;  %v3673_v55 = vld [vmem:[%s4474_s22 + $0x430] ss:$8 sps:$4 sm:$0xff]  }
 0x45c   : > { %2124 = vmatprep.subr.bf16.mxu1 %v3519_v58  ;;  %v3600_v58 = vld [vmem:[%s4474_s22 + $0x304] ss:$8 sps:$4 sm:$0xff]  }
 0x45e   : > { %2084 = vmatpush2.bf16.msra.mxu0 %v3521_v59  ;;  %v3595_v59 = vld [vmem:[%s4474_s22 + $0x200] ss:$8 sps:$4 sm:$0xff]  }
 0x45f   : > { %2125 = vmatpush2.bf16.msra.mxu1 %v3522_v60  ;;  %2085 = vmatprep.subr.bf16.mxu0 %v3523_v61  ;;  %v3598_v60 = vld [vmem:[%s4474_s22 + $0x300] ss:$8 sps:$4 sm:$0xff]   ;;  %v3603_v61 = vld [vmem:[%s4474_s22 + $0x2f4] ss:$8 sps:$4 sm:$0xff]  }
 0x460   : > { %2126 = vmatprep.subr.bf16.mxu1 %v3525_v62  ;;  %v3606_v62 = vld [vmem:[%s4474_s22 + $0x3f4] ss:$8 sps:$4 sm:$0xff]  }
 0x462   : > { %2086 = vmatpush2.bf16.msra.mxu0 %v3527_v0  ;;  %v3604_v0 = vld [vmem:[%s4474_s22 + $0x3f0] ss:$8 sps:$4 sm:$0xff]  }
 0x463   : > { %2127 = vmatpush2.bf16.msra.mxu1 %v3528_v1  ;;  %2087 = vmatprep.subr.bf16.mxu0 %v3529_v4  ;;  %v3609_v1 = vld [vmem:[%s4474_s22 + $0x2e4] ss:$8 sps:$4 sm:$0xff]   ;;  %v3610_v4 = vld [vmem:[%s4474_s22 + $0x3e0] ss:$8 sps:$4 sm:$0xff]  }
 0x464   : > { %2128 = vmatprep.subr.bf16.mxu1 %v3531_v6  ;;  %v3618_v6 = vld [vmem:[%s4474_s22 + $0x3d4] ss:$8 sps:$4 sm:$0xff]  }
 0x466   : > { %2088 = vmatpush2.bf16.msra.mxu0 %v3533_v7  ;;  %v3613_v7 = vld [vmem:[%s4474_s22 + $0x2d0] ss:$8 sps:$4 sm:$0xff]  }
 0x467   : > { %2129 = vmatpush2.bf16.msra.mxu1 %v3534_v8  ;;  %2089 = vmatprep.subr.bf16.mxu0 %v3535_v9  ;;  %v3616_v8 = vld [vmem:[%s4474_s22 + $0x3d0] ss:$8 sps:$4 sm:$0xff]   ;;  %v3621_v9 = vld [vmem:[%s4474_s22 + $0x2c4] ss:$8 sps:$4 sm:$0xff]  }
 0x468   : > { %2130 = vmatprep.subr.bf16.mxu1 %v3537_v10  ;;  %v3624_v10 = vld [vmem:[%s4474_s22 + $0x3c4] ss:$8 sps:$4 sm:$0xff]  }
 0x46a   : > { %2090 = vmatpush2.bf16.msra.mxu0 %v3539_v11  ;;  %v3619_v11 = vld [vmem:[%s4474_s22 + $0x2c0] ss:$8 sps:$4 sm:$0xff]  }
 0x46b   : > { %2131 = vmatpush2.bf16.msra.mxu1 %v3540_v12  ;;  %2091 = vmatprep.subr.bf16.mxu0 %v3541_v13  ;;  %v3622_v12 = vld [vmem:[%s4474_s22 + $0x3c0] ss:$8 sps:$4 sm:$0xff]   ;;  %v3627_v13 = vld [vmem:[%s4474_s22 + $0x2b4] ss:$8 sps:$4 sm:$0xff]  }
 0x46c   : > { %2132 = vmatprep.subr.bf16.mxu1 %v3543_v14  ;;  %v3630_v14 = vld [vmem:[%s4474_s22 + $0x3b4] ss:$8 sps:$4 sm:$0xff]  }
 0x46e   : > { %2092 = vmatpush2.bf16.msra.mxu0 %v3545_v15  ;;  %v3625_v15 = vld [vmem:[%s4474_s22 + $0x2b0] ss:$8 sps:$4 sm:$0xff]  }
 0x46f   : > { %2133 = vmatpush2.bf16.msra.mxu1 %v3546_v16  ;;  %2093 = vmatprep.subr.bf16.mxu0 %v3547_v17  ;;  %v3628_v16 = vld [vmem:[%s4474_s22 + $0x3b0] ss:$8 sps:$4 sm:$0xff]   ;;  %v3633_v17 = vld [vmem:[%s4474_s22 + $0x2a4] ss:$8 sps:$4 sm:$0xff]  }
 0x470   : > { %2134 = vmatprep.subr.bf16.mxu1 %v3549_v18  ;;  %v3636_v18 = vld [vmem:[%s4474_s22 + $0x3a4] ss:$8 sps:$4 sm:$0xff]  }
 0x472   : > { %2094 = vmatpush2.bf16.msra.mxu0 %v3551_v19  ;;  %v3631_v19 = vld [vmem:[%s4474_s22 + $0x2a0] ss:$8 sps:$4 sm:$0xff]  }
 0x473   : > { %2135 = vmatpush2.bf16.msra.mxu1 %v3552_v20  ;;  %2145 = vmatprep.subr.bf16.mxu0 %v3555_v23  ;;  %v3634_v20 = vld [vmem:[%s4474_s22 + $0x3a0] ss:$8 sps:$4 sm:$0xff]   ;;  %v3637_v23 = vld [vmem:[%s4474_s22 + $0x290] ss:$8 sps:$4 sm:$0xff]  }
 0x474   : > { %2186 = vmatprep.subr.bf16.mxu1 %v3558_v24  ;;  %v3640_v24 = vld [vmem:[%s4474_s22 + $0x390] ss:$8 sps:$4 sm:$0xff]  }
 0x475   : > { %2096 = vmatmul.mubr.bf16.vlgmr.msra.gmra.mxu0 %v899_v25  ;;  %v3645_v25 = vld [vmem:[%s4474_s22 + $0x284] ss:$8 sps:$4 sm:$0xff]  }
 0x476   : > { %2137 = vmatmul.mubr.bf16.vlgmr.msra.gmra.mxu1 %v901_v26  ;;  %2146 = vmatpush1.bf16.msra.mxu0 %v3553_v27  ;;  %v3648_v26 = vld [vmem:[%s4474_s22 + $0x384] ss:$8 sps:$4 sm:$0xff]   ;;  %v3643_v27 = vld [vmem:[%s4474_s22 + $0x280] ss:$8 sps:$4 sm:$0xff]  }
 0x477   : > { %2187 = vmatpush1.bf16.msra.mxu1 %v3556_v28  ;;  %2147 = vmatprep.subr.bf16.mxu0 %v3561_v29  ;;  %v3646_v28 = vld [vmem:[%s4474_s22 + $0x380] ss:$8 sps:$4 sm:$0xff]  }
 0x478   : > { %2188 = vmatprep.subr.bf16.mxu1 %v3564_v30  ;;  %2177 = vmatprep.mubr.bf16.mxu0 %v904_v54  ;;  %v891_v29 = vld [vmem:[%s4504_s17 + $0x20] sm:$0xff]  ;;  %v893_v30 = vld [vmem:[%s4504_s17 + $0x30] sm:$0xff] }
 0x479   : > { %2218 = vmatprep.mubr.bf16.mxu1 %v906_v57  ;;  %v3678_v54 = vld [vmem:[%s4474_s22 + $0x534] ss:$8 sps:$4 sm:$0xff]   ;;  %v3681_v57 = vld [vmem:[%s4474_s22 + $0x424] ss:$8 sps:$4 sm:$0xff]  }
 0x47a   : > { %2148 = vmatpush1.bf16.msra.mxu0 %v3559_v31  ;;  %v3651_v31 = vld [vmem:[%s4474_s22 + $0x474] ss:$8 sps:$4 sm:$0xff]  }
 0x47b   : > { %2189 = vmatpush1.bf16.msra.mxu1 %v3562_v32  ;;  %2149 = vmatprep.subr.bf16.mxu0 %v3567_v33  ;;  %v3654_v32 = vld [vmem:[%s4474_s22 + $0x574] ss:$8 sps:$4 sm:$0xff]   ;;  %v903_v33 = vpack.c.bf16 %v891_v29, %v891_v29 }
 0x47c   : > { %2190 = vmatprep.subr.bf16.mxu1 %v3570_v34  ;;  %v905_v34 = vpack.c.bf16 %v893_v30, %v893_v30  ;;  %v3735_v29 = vld [vmem:[%s4474_s22 + $0x494] ss:$8 sps:$4 sm:$0xff]  }
 0x47d   : > { %v3738_v30 = vld [vmem:[%s4474_s22 + $0x594] ss:$8 sps:$4 sm:$0xff]  }
 0x47e   : > { %2150 = vmatpush1.bf16.msra.mxu0 %v3565_v35  ;;  %v3649_v35 = vld [vmem:[%s4474_s22 + $0x470] ss:$8 sps:$4 sm:$0xff]  }
 0x47f   : > { %2191 = vmatpush1.bf16.msra.mxu1 %v3568_v36  ;;  %2151 = vmatprep.subr.bf16.mxu0 %v3573_v37  ;;  %v3652_v36 = vld [vmem:[%s4474_s22 + $0x570] ss:$8 sps:$4 sm:$0xff]   ;;  %v3657_v37 = vld [vmem:[%s4474_s22 + $0x464] ss:$8 sps:$4 sm:$0xff]  }
 0x480   : > { %2192 = vmatprep.subr.bf16.mxu1 %v3576_v38  ;;  %v3660_v38 = vld [vmem:[%s4474_s22 + $0x564] ss:$8 sps:$4 sm:$0xff]  }
 0x482   : > { %2152 = vmatpush1.bf16.msra.mxu0 %v3571_v39  ;;  %v896_v39 = vld [vmem:[%s4504_s17 + $0x48] sm:$0xff] }
 0x483   : > { %2193 = vmatpush1.bf16.msra.mxu1 %v3574_v40  ;;  %2153 = vmatprep.subr.bf16.mxu0 %v3579_v41  ;;  %v908_v40 = vpack.c.bf16 %v896_v39, %v896_v39  ;;  %v898_v41 = vld [vmem:[%s4504_s17 + $0x58] sm:$0xff] }
 0x484   : > { %2194 = vmatprep.subr.bf16.mxu1 %v3582_v42  ;;  %v3655_v42 = vld [vmem:[%s4474_s22 + $0x460] ss:$8 sps:$4 sm:$0xff]  }
 0x486   : > { %2154 = vmatpush1.bf16.msra.mxu0 %v3577_v43  ;;  %v3658_v43 = vld [vmem:[%s4474_s22 + $0x560] ss:$8 sps:$4 sm:$0xff]  }
 0x487   : > { %2195 = vmatpush1.bf16.msra.mxu1 %v3580_v44  ;;  %2155 = vmatprep.subr.bf16.mxu0 %v3585_v45  ;;  %v910_v44 = vpack.c.bf16 %v898_v41, %v898_v41  ;;  %v3663_v45 = vld [vmem:[%s4474_s22 + $0x454] ss:$8 sps:$4 sm:$0xff]  }
 0x488   : > { %2196 = vmatprep.subr.bf16.mxu1 %v3588_v46  ;;  %v3666_v46 = vld [vmem:[%s4474_s22 + $0x554] ss:$8 sps:$4 sm:$0xff]  }
 0x48a   : > { %2156 = vmatpush1.bf16.msra.mxu0 %v3583_v47  ;;  %v3661_v47 = vld [vmem:[%s4474_s22 + $0x450] ss:$8 sps:$4 sm:$0xff]  }
 0x48b   : > { %2197 = vmatpush1.bf16.msra.mxu1 %v3586_v48  ;;  %2157 = vmatprep.subr.bf16.mxu0 %v3591_v49  ;;  %v3664_v48 = vld [vmem:[%s4474_s22 + $0x550] ss:$8 sps:$4 sm:$0xff]   ;;  %v3669_v49 = vld [vmem:[%s4474_s22 + $0x444] ss:$8 sps:$4 sm:$0xff]  }
 0x48c   : > { %2198 = vmatprep.subr.bf16.mxu1 %v3594_v50  ;;  %v3672_v50 = vld [vmem:[%s4474_s22 + $0x544] ss:$8 sps:$4 sm:$0xff]  }
 0x48e   : > { %2158 = vmatpush1.bf16.msra.mxu0 %v3589_v52  ;;  %v3670_v52 = vld [vmem:[%s4474_s22 + $0x540] ss:$8 sps:$4 sm:$0xff]  }
 0x48f   : > { %2199 = vmatpush1.bf16.msra.mxu1 %v3592_v53  ;;  %2159 = vmatprep.subr.bf16.mxu0 %v3597_v56  ;;  %v3675_v53 = vld [vmem:[%s4474_s22 + $0x434] ss:$8 sps:$4 sm:$0xff]   ;;  %v3676_v56 = vld [vmem:[%s4474_s22 + $0x530] ss:$8 sps:$4 sm:$0xff]  }
 0x490   : > { %2200 = vmatprep.subr.bf16.mxu1 %v3600_v58  ;;  %v3684_v58 = vld [vmem:[%s4474_s22 + $0x524] ss:$8 sps:$4 sm:$0xff]  }
 0x492   : > { %2160 = vmatpush1.bf16.msra.mxu0 %v3595_v59  ;;  %v3679_v59 = vld [vmem:[%s4474_s22 + $0x420] ss:$8 sps:$4 sm:$0xff]  }
 0x493   : > { %2201 = vmatpush1.bf16.msra.mxu1 %v3598_v60  ;;  %2161 = vmatprep.subr.bf16.mxu0 %v3603_v61  ;;  %v3682_v60 = vld [vmem:[%s4474_s22 + $0x520] ss:$8 sps:$4 sm:$0xff]   ;;  %v3687_v61 = vld [vmem:[%s4474_s22 + $0x414] ss:$8 sps:$4 sm:$0xff]  }
 0x494   : > { %2202 = vmatprep.subr.bf16.mxu1 %v3606_v62  ;;  %v3690_v62 = vld [vmem:[%s4474_s22 + $0x514] ss:$8 sps:$4 sm:$0xff]  }
 0x496   : > { %2162 = vmatpush2.bf16.msra.mxu0 %v3601_v63  ;;  %v3685_v63 = vld [vmem:[%s4474_s22 + $0x410] ss:$8 sps:$4 sm:$0xff]  }
 0x497   : > { %2203 = vmatpush2.bf16.msra.mxu1 %v3604_v0  ;;  %2163 = vmatprep.subr.bf16.mxu0 %v3609_v1  ;;  %v3688_v0 = vld [vmem:[%s4474_s22 + $0x510] ss:$8 sps:$4 sm:$0xff]   ;;  %v3693_v1 = vld [vmem:[%s4474_s22 + $0x404] ss:$8 sps:$4 sm:$0xff]  }
 0x498   : > { %2204 = vmatprep.subr.bf16.mxu1 %v3612_v2  ;;  %v3696_v2 = vld [vmem:[%s4474_s22 + $0x504] ss:$8 sps:$4 sm:$0xff]  }
 0x49a   : > { %2164 = vmatpush2.bf16.msra.mxu0 %v3607_v3  ;;  %v3691_v3 = vld [vmem:[%s4474_s22 + $0x400] ss:$8 sps:$4 sm:$0xff]  }
 0x49b   : > { %2205 = vmatpush2.bf16.msra.mxu1 %v3610_v4  ;;  %2165 = vmatprep.subr.bf16.mxu0 %v3615_v5  ;;  %v3694_v4 = vld [vmem:[%s4474_s22 + $0x500] ss:$8 sps:$4 sm:$0xff]   ;;  %v3699_v5 = vld [vmem:[%s4474_s22 + $0x4f4] ss:$8 sps:$4 sm:$0xff]  }
 0x49c   : > { %2206 = vmatprep.subr.bf16.mxu1 %v3618_v6  ;;  %v3702_v6 = vld [vmem:[%s4474_s22 + $0x5f4] ss:$8 sps:$4 sm:$0xff]  }
 0x49e   : > { %2166 = vmatpush2.bf16.msra.mxu0 %v3613_v7  ;;  %v3697_v7 = vld [vmem:[%s4474_s22 + $0x4f0] ss:$8 sps:$4 sm:$0xff]  }
 0x49f   : > { %2207 = vmatpush2.bf16.msra.mxu1 %v3616_v8  ;;  %2167 = vmatprep.subr.bf16.mxu0 %v3621_v9  ;;  %v3700_v8 = vld [vmem:[%s4474_s22 + $0x5f0] ss:$8 sps:$4 sm:$0xff]   ;;  %v3705_v9 = vld [vmem:[%s4474_s22 + $0x4e4] ss:$8 sps:$4 sm:$0xff]  }
 0x4a0   : > { %2208 = vmatprep.subr.bf16.mxu1 %v3624_v10  ;;  %v3708_v10 = vld [vmem:[%s4474_s22 + $0x5e4] ss:$8 sps:$4 sm:$0xff]  }
 0x4a2   : > { %2168 = vmatpush2.bf16.msra.mxu0 %v3619_v11  ;;  %v3703_v11 = vld [vmem:[%s4474_s22 + $0x4e0] ss:$8 sps:$4 sm:$0xff]  }
 0x4a3   : > { %2209 = vmatpush2.bf16.msra.mxu1 %v3622_v12  ;;  %2169 = vmatprep.subr.bf16.mxu0 %v3627_v13  ;;  %v3706_v12 = vld [vmem:[%s4474_s22 + $0x5e0] ss:$8 sps:$4 sm:$0xff]   ;;  %v3711_v13 = vld [vmem:[%s4474_s22 + $0x4d4] ss:$8 sps:$4 sm:$0xff]  }
 0x4a4   : > { %2210 = vmatprep.subr.bf16.mxu1 %v3630_v14  ;;  %v3714_v14 = vld [vmem:[%s4474_s22 + $0x5d4] ss:$8 sps:$4 sm:$0xff]  }
 0x4a6   : > { %2170 = vmatpush2.bf16.msra.mxu0 %v3625_v15  ;;  %v3709_v15 = vld [vmem:[%s4474_s22 + $0x4d0] ss:$8 sps:$4 sm:$0xff]  }
 0x4a7   : > { %2211 = vmatpush2.bf16.msra.mxu1 %v3628_v16  ;;  %2171 = vmatprep.subr.bf16.mxu0 %v3633_v17  ;;  %v3712_v16 = vld [vmem:[%s4474_s22 + $0x5d0] ss:$8 sps:$4 sm:$0xff]   ;;  %v3717_v17 = vld [vmem:[%s4474_s22 + $0x4c4] ss:$8 sps:$4 sm:$0xff]  }
 0x4a8   : > { %2212 = vmatprep.subr.bf16.mxu1 %v3636_v18  ;;  %v3720_v18 = vld [vmem:[%s4474_s22 + $0x5c4] ss:$8 sps:$4 sm:$0xff]  }
 0x4aa   : > { %2172 = vmatpush2.bf16.msra.mxu0 %v3631_v19  ;;  %v3715_v19 = vld [vmem:[%s4474_s22 + $0x4c0] ss:$8 sps:$4 sm:$0xff]  }
 0x4ab   : > { %2213 = vmatpush2.bf16.msra.mxu1 %v3634_v20  ;;  %2173 = vmatprep.subr.bf16.mxu0 %v3639_v21  ;;  %v3718_v20 = vld [vmem:[%s4474_s22 + $0x5c0] ss:$8 sps:$4 sm:$0xff]   ;;  %v3723_v21 = vld [vmem:[%s4474_s22 + $0x4b4] ss:$8 sps:$4 sm:$0xff]  }
 0x4ac   : > { %2214 = vmatprep.subr.bf16.mxu1 %v3642_v22  ;;  %v3726_v22 = vld [vmem:[%s4474_s22 + $0x5b4] ss:$8 sps:$4 sm:$0xff]  }
 0x4ae   : > { %2174 = vmatpush2.bf16.msra.mxu0 %v3637_v23  ;;  %v3721_v23 = vld [vmem:[%s4474_s22 + $0x4b0] ss:$8 sps:$4 sm:$0xff]  }
 0x4af   : > { %2215 = vmatpush2.bf16.msra.mxu1 %v3640_v24  ;;  %2175 = vmatprep.subr.bf16.mxu0 %v3645_v25  ;;  %v3724_v24 = vld [vmem:[%s4474_s22 + $0x5b0] ss:$8 sps:$4 sm:$0xff]   ;;  %v3729_v25 = vld [vmem:[%s4474_s22 + $0x4a4] ss:$8 sps:$4 sm:$0xff]  }
 0x4b0   : > { %2216 = vmatprep.subr.bf16.mxu1 %v3648_v26  ;;  %v3732_v26 = vld [vmem:[%s4474_s22 + $0x5a4] ss:$8 sps:$4 sm:$0xff]  }
 0x4b2   : > { %2176 = vmatpush2.bf16.msra.mxu0 %v3643_v27  ;;  %v3727_v27 = vld [vmem:[%s4474_s22 + $0x4a0] ss:$8 sps:$4 sm:$0xff]  }
 0x4b3   : > { %2217 = vmatpush2.bf16.msra.mxu1 %v3646_v28  ;;  %2227 = vmatprep.subr.bf16.mxu0 %v3651_v31  ;;  %v3730_v28 = vld [vmem:[%s4474_s22 + $0x5a0] ss:$8 sps:$4 sm:$0xff]   ;;  %v3733_v31 = vld [vmem:[%s4474_s22 + $0x490] ss:$8 sps:$4 sm:$0xff]  }
 0x4b4   : > { %2268 = vmatprep.subr.bf16.mxu1 %v3654_v32  ;;  %v3736_v32 = vld [vmem:[%s4474_s22 + $0x590] ss:$8 sps:$4 sm:$0xff]  }
 0x4b5   : > { %2178 = vmatmul.mubr.bf16.vlgmr.msra.gmra.mxu0 %v903_v33  ;;  %v3741_v33 = vld [vmem:[%s4474_s22 + $0x484] ss:$8 sps:$4 sm:$0xff]  }
 0x4b6   : > { %2219 = vmatmul.mubr.bf16.vlgmr.msra.gmra.mxu1 %v905_v34  ;;  %2228 = vmatpush1.bf16.msra.mxu0 %v3649_v35  ;;  %v3744_v34 = vld [vmem:[%s4474_s22 + $0x584] ss:$8 sps:$4 sm:$0xff]   ;;  %v3739_v35 = vld [vmem:[%s4474_s22 + $0x480] ss:$8 sps:$4 sm:$0xff]  }
 0x4b7   : > { %2269 = vmatpush1.bf16.msra.mxu1 %v3652_v36  ;;  %2229 = vmatprep.subr.bf16.mxu0 %v3657_v37  ;;  %v3742_v36 = vld [vmem:[%s4474_s22 + $0x580] ss:$8 sps:$4 sm:$0xff]   ;;  %s4192_s22 = smov (!%p3219_p6), 64  }
 0x4b8   : > { %2270 = vmatprep.subr.bf16.mxu1 %v3660_v38  ;;  %2259 = vmatprep.mubr.bf16.mxu0 %v908_v40  ;;  %v895_v37 = vld [vmem:[%s4504_s17 + $0x40] sm:$0xff]  ;;  %v897_v38 = vld [vmem:[%s4504_s17 + $0x50] sm:$0xff] }
 0x4b9   : > { %2300 = vmatprep.mubr.bf16.mxu1 %v910_v44  ;;  %v907_v39 = vpack.c.bf16 %v895_v37, %v895_v37  ;;  %v909_v40 = vpack.c.bf16 %v897_v38, %v897_v38 }
 0x4ba   : > { %2230 = vmatpush1.bf16.msra.mxu0 %v3655_v42 }
 0x4bb   : > { %2271 = vmatpush1.bf16.msra.mxu1 %v3658_v43  ;;  %2231 = vmatprep.subr.bf16.mxu0 %v3663_v45 }
 0x4bc   : > { %2272 = vmatprep.subr.bf16.mxu1 %v3666_v46 }
 0x4be   : > { %2232 = vmatpush1.bf16.msra.mxu0 %v3661_v47 }
 0x4bf   : > { %2273 = vmatpush1.bf16.msra.mxu1 %v3664_v48  ;;  %2233 = vmatprep.subr.bf16.mxu0 %v3669_v49 }
 0x4c0   : > { %2274 = vmatprep.subr.bf16.mxu1 %v3672_v50 }
 0x4c2   : > { %2234 = vmatpush1.bf16.msra.mxu0 %v3667_v51 }
 0x4c3   : > { %2275 = vmatpush1.bf16.msra.mxu1 %v3670_v52  ;;  %2235 = vmatprep.subr.bf16.mxu0 %v3675_v53 }
 0x4c4   : > { %2276 = vmatprep.subr.bf16.mxu1 %v3678_v54 }
 0x4c6   : > { %2236 = vmatpush1.bf16.msra.mxu0 %v3673_v55 }
 0x4c7   : > { %2277 = vmatpush1.bf16.msra.mxu1 %v3676_v56  ;;  %2237 = vmatprep.subr.bf16.mxu0 %v3681_v57 }
 0x4c8   : > { %2278 = vmatprep.subr.bf16.mxu1 %v3684_v58 }
 0x4ca   : > { %2238 = vmatpush1.bf16.msra.mxu0 %v3679_v59 }
 0x4cb   : > { %2279 = vmatpush1.bf16.msra.mxu1 %v3682_v60  ;;  %2239 = vmatprep.subr.bf16.mxu0 %v3687_v61 }
 0x4cc   : > { %2280 = vmatprep.subr.bf16.mxu1 %v3690_v62 }
 0x4ce   : > { %2240 = vmatpush1.bf16.msra.mxu0 %v3685_v63 }
 0x4cf   : > { %2281 = vmatpush1.bf16.msra.mxu1 %v3688_v0  ;;  %2241 = vmatprep.subr.bf16.mxu0 %v3693_v1 }
 0x4d0   : > { %2282 = vmatprep.subr.bf16.mxu1 %v3696_v2  ;;  %v885_v2 = vld [vmem:[#allocation2] sm:$0xff] }
 0x4d2   : > { %2242 = vmatpush1.bf16.msra.mxu0 %v3691_v3 }
 0x4d3   : > { %2283 = vmatpush1.bf16.msra.mxu1 %v3694_v4  ;;  %2243 = vmatprep.subr.bf16.mxu0 %v3699_v5 }
 0x4d4   : > { %2284 = vmatprep.subr.bf16.mxu1 %v3702_v6 }
 0x4d6   : > { %2244 = vmatpush2.bf16.msra.mxu0 %v3697_v7  ;;  %v886_v7 = vld [vmem:[#allocation2 + $0x8] sm:$0xff] }
 0x4d7   : > { %2285 = vmatpush2.bf16.msra.mxu1 %v3700_v8  ;;  %2245 = vmatprep.subr.bf16.mxu0 %v3705_v9 }
 0x4d8   : > { %2286 = vmatprep.subr.bf16.mxu1 %v3708_v10 }
 0x4da   : > { %2246 = vmatpush2.bf16.msra.mxu0 %v3703_v11 }
 0x4db   : > { %2287 = vmatpush2.bf16.msra.mxu1 %v3706_v12  ;;  %2247 = vmatprep.subr.bf16.mxu0 %v3711_v13 }
 0x4dc   : > { %2288 = vmatprep.subr.bf16.mxu1 %v3714_v14 }
 0x4de   : > { %2248 = vmatpush2.bf16.msra.mxu0 %v3709_v15 }
 0x4df   : > { %2289 = vmatpush2.bf16.msra.mxu1 %v3712_v16  ;;  %2249 = vmatprep.subr.bf16.mxu0 %v3717_v17 }
 0x4e0   : > { %2290 = vmatprep.subr.bf16.mxu1 %v3720_v18 }
 0x4e2   : > { %2250 = vmatpush2.bf16.msra.mxu0 %v3715_v19 }
 0x4e3   : > { %2291 = vmatpush2.bf16.msra.mxu1 %v3718_v20  ;;  %2251 = vmatprep.subr.bf16.mxu0 %v3723_v21 }
 0x4e4   : > { %2292 = vmatprep.subr.bf16.mxu1 %v3726_v22 }
 0x4e6   : > { %2252 = vmatpush2.bf16.msra.mxu0 %v3721_v23 }
 0x4e7   : > { %2293 = vmatpush2.bf16.msra.mxu1 %v3724_v24  ;;  %2253 = vmatprep.subr.bf16.mxu0 %v3729_v25 }
 0x4e8   : > { %2294 = vmatprep.subr.bf16.mxu1 %v3732_v26 }
 0x4ea   : > { %2254 = vmatpush2.bf16.msra.mxu0 %v3727_v27 }
 0x4eb   : > { %2295 = vmatpush2.bf16.msra.mxu1 %v3730_v28  ;;  %2255 = vmatprep.subr.bf16.mxu0 %v3735_v29 }
 0x4ec   : > { %2296 = vmatprep.subr.bf16.mxu1 %v3738_v30 }
 0x4ee   : > { %2256 = vmatpush2.bf16.msra.mxu0 %v3733_v31 }
 0x4ef   : > { %2297 = vmatpush2.bf16.msra.mxu1 %v3736_v32  ;;  %2257 = vmatprep.subr.bf16.mxu0 %v3741_v33 }
 0x4f0   : > { %2298 = vmatprep.subr.bf16.mxu1 %v3744_v34 }
 0x4f2   : > { %2258 = vmatpush2.bf16.msra.mxu0 %v3739_v35 }
 0x4f3   : > { %2299 = vmatpush2.bf16.msra.mxu1 %v3742_v36 }
 0x4f5   : > { %2260 = vmatmul.mubr.bf16.vlgmr.msra.gmra.mxu0 %v907_v39 }
 0x4f6   : > { %2301 = vmatmul.mubr.bf16.vlgmr.msra.gmra.mxu1 %v909_v40 }
 0x535   : > { %v2097_v41 = vpop.f32.mrf.mxu0 }
 0x536   : > { %v2138_v42 = vpop.f32.mrf.mxu1 }
 0x537   : > { %v2139_v43 = vadd.f32 %v2138_v42, %v2097_v41  ;;  %v2099_v44 = vpop.f32.mrf.mxu0 }
 0x538   : > { %v2140_v45 = vpop.f32.mrf.mxu1 }
 0x539   : > { %v2141_v46 = vadd.f32 %v2140_v45, %v2099_v44  ;;  %v2101_v47 = vpop.f32.mrf.mxu0 }
 0x53a   : > { %v2142_v48 = vpop.f32.mrf.mxu1 }
 0x53b   : > { %v2102_v49 = vpop.f32.mrf.mxu0 }
 0x53c   : > { %v2143_v50 = vpop.f32.mrf.mxu1 }
 0x575   : > { %v2179_v51 = vpop.f32.mrf.mxu0 }
 0x576   : > { %v2220_v52 = vpop.f32.mrf.mxu1  ;;  %v2180_v59 = vadd.f32 %v2179_v51, %v2139_v43 }
 0x577   : > { %v2181_v53 = vpop.f32.mrf.mxu0 }
 0x578   : > { %v2222_v54 = vpop.f32.mrf.mxu1  ;;  %v2182_v60 = vadd.f32 %v2181_v53, %v2141_v46  ;;  %v2221_v61 = vadd.f32 %v2220_v52, %v2180_v59 }
 0x579   : > { %v2183_v55 = vpop.f32.mrf.mxu0 }
 0x57a   : > { %v2224_v56 = vpop.f32.mrf.mxu1  ;;  %v2223_v0 = vadd.f32 %v2222_v54, %v2182_v60 }
 0x57b   : > { %v2184_v57 = vpop.f32.mrf.mxu0 }
 0x57c   : > { %v2225_v58 = vpop.f32.mrf.mxu1 }
 0x5b5   : > { %v2261_v62 = vpop.f32.mrf.mxu0 }
 0x5b6   : > { %v2302_v63 = vpop.f32.mrf.mxu1  ;;  %v2262_v1 = vadd.f32 %v2261_v62, %v2221_v61 }
 0x5b7   : > { %v2263_v3 = vpop.f32.mrf.mxu0 }
 0x5b8   : > { %v2304_v4 = vpop.f32.mrf.mxu1  ;;  %v2303_v5 = vadd.f32 %v2302_v63, %v2262_v1  ;;  %v2264_v6 = vadd.f32 %v2263_v3, %v2223_v0 }
 0x5b9   : > { %v2265_v8 = vpop.f32.mrf.mxu0 }
 0x5ba   : > { %v2306_v9 = vpop.f32.mrf.mxu1  ;;  %v2309_v10 = vadd.f32 %v2303_v5, %v885_v2  ;;  %v2305_v11 = vadd.f32 %v2304_v4, %v2264_v6  ;;  %2316 = sbr.rel (%p3219_p6) target bundleno = 2675 (0xa73), region = 132 }
 0x5bb   : > { %v2266_v12 = vpop.f32.mrf.mxu0 }
 0x5bc   : > { %v2307_v13 = vpop.f32.mrf.mxu1  ;;  %2311 = vst [vmem:[#allocation2] sm:$0xff] %v2309_v10  ;;  %v2310_v14 = vadd.f32 %v2305_v11, %v886_v7 }
 0x5be   : > { %2312 = vst [vmem:[#allocation2 + $0x8] sm:$0xff] %v2310_v14 }
 0x5bf   : > { %v3220_v15 = vld [vmem:[#allocation3] ss:$0 sm:$0xff]  ;;  %v4187_v16 = vmov 1   ;;  %v4188_v17 = vmov 0   ;;  %v2378_v18 = vld [vmem:[#allocation15 + $0x78] sm:$0xff]  ;;  %v4189_v19 = vmov 3  }
 0x5c0   : > { %3745 = vset.pattern.permute.xlu0 %v4187_v16  ;;  %3747 = vset.pattern.permute.xlu1 %v4188_v17  ;;  %v4190_v20 = vmov 2   ;;  %v2377_v21 = vld [vmem:[#allocation15 + $0x70] sm:$0xff]  ;;  %v2376_v22 = vld [vmem:[#allocation15 + $0x68] sm:$0xff]  ;;  %v2375_v23 = vld [vmem:[#allocation15 + $0x60] sm:$0xff]  ;;  %v4191_v38 = vmov 0.0   ;;  %vm2379_vm5 = vcmask 523264  }
 0x5c1   : > { %2331 = vperm.xlu0 %3745, %v3220_v15   ;;  %2326 = vperm.xlu1 %3747, %v3220_v15   ;;  %v2374_v24 = vld [vmem:[#allocation15 + $0x58] sm:$0xff]  ;;  %v2373_v25 = vld [vmem:[#allocation15 + $0x50] sm:$0xff]  ;;  %v2372_v26 = vld [vmem:[#allocation15 + $0x48] sm:$0xff] }
 0x5c2   : > { %2399 = vmatprep.subr.mxu0 %v2378_v18  ;;  %v2371_v27 = vld [vmem:[#allocation15 + $0x40] sm:$0xff]  ;;  %v2370_v28 = vld [vmem:[#allocation15 + $0x38] sm:$0xff]  ;;  %v2369_v29 = vld [vmem:[#allocation15 + $0x30] sm:$0xff]  ;;  %2447 = vmatprep.mubr.f32.mxu0 %v4191_v38 }
 0x5c3   : > { %2400 = vmatpush1.msra.mxu0 %v2377_v21  ;;  %v2368_v30 = vld [vmem:[#allocation15 + $0x28] sm:$0xff]  ;;  %v2367_v31 = vld [vmem:[#allocation15 + $0x20] sm:$0xff]  ;;  %v2366_v32 = vld [vmem:[#allocation15 + $0x18] sm:$0xff]  ;;  %2581 = vmatprep.mubr.f32.mxu1 %v4191_v38 }
 0x5c4   : > { %2401 = vmatprep.subr.mxu0 %v2376_v22  ;;  %v2365_v33 = vld [vmem:[#allocation15 + $0x10] sm:$0xff]  ;;  %v2318_v34 = vld [vmem:[#allocation2] sm:$0xff]  ;;  %v2364_v35 = vld [vmem:[#allocation15 + $0x8] sm:$0xff] }
 0x5c5   : > { %3746 = vset.pattern.permute.xlu0 %v4189_v19  ;;  %3748 = vset.pattern.permute.xlu1 %v4190_v20  ;;  %v2363_v36 = vld [vmem:[#allocation15] sm:$0xff]  ;;  %v3221_v50 = vld [vmem:[#allocation4] ss:$0 sm:$0xff]  ;;  %v2512_v60 = vld [vmem:[#allocation18 + $0x70] sm:$0xff] }
 0x5c6   : > { %2347 = vperm.xlu0 %3746, %v3220_v15   ;;  %2341 = vperm.xlu1 %3748, %v3220_v15   ;;  %v2319_v40 = vld [vmem:[#allocation2 + $0x8] sm:$0xff]  ;;  %v2511_v61 = vld [vmem:[#allocation18 + $0x68] sm:$0xff]  ;;  %v2508_v0 = vld [vmem:[#allocation18 + $0x50] sm:$0xff] }
 0x5c7   : > { %2402 = vmatpush1.msra.mxu0 %v2375_v23  ;;  %v2513_v59 = vld [vmem:[#allocation18 + $0x78] sm:$0xff]  ;;  %v2510_v62 = vld [vmem:[#allocation18 + $0x60] sm:$0xff]  ;;  %v2507_v1 = vld [vmem:[#allocation18 + $0x48] sm:$0xff] }
 0x5c8   : > { %2403 = vmatprep.subr.mxu0 %v2374_v24  ;;  %2533 = vmatprep.subr.mxu1 %v2513_v59  ;;  %v2509_v63 = vld [vmem:[#allocation18 + $0x58] sm:$0xff]  ;;  %v2506_v2 = vld [vmem:[#allocation18 + $0x40] sm:$0xff]  ;;  %v2504_v4 = vld [vmem:[#allocation18 + $0x30] sm:$0xff] }
 0x5c9   : > { %2404 = vmatpush1.msra.mxu0 %v2373_v25  ;;  %2534 = vmatpush1.msra.mxu1 %v2512_v60  ;;  %v2505_v3 = vld [vmem:[#allocation18 + $0x38] sm:$0xff]  ;;  %v2503_v5 = vld [vmem:[#allocation18 + $0x28] sm:$0xff]  ;;  %v2502_v6 = vld [vmem:[#allocation18 + $0x20] sm:$0xff] }
 0x5ca   : > { %2405 = vmatprep.subr.mxu0 %v2372_v26  ;;  %2535 = vmatprep.subr.mxu1 %v2511_v61  ;;  %v2501_v7 = vld [vmem:[#allocation18 + $0x18] sm:$0xff]  ;;  %v2500_v8 = vld [vmem:[#allocation18 + $0x10] sm:$0xff]  ;;  %v2499_v9 = vld [vmem:[#allocation18 + $0x8] sm:$0xff] }
 0x5cb   : > { %2406 = vmatpush1.msra.mxu0 %v2371_v27  ;;  %2536 = vmatpush1.msra.mxu1 %v2510_v62  ;;  %v2498_v10 = vld [vmem:[#allocation18] sm:$0xff]  ;;  %v2653_v61 = vld [vmem:[#allocation21 + $0xb0] sm:$0xff]  ;;  %v2648_v62 = vld [vmem:[#allocation21 + $0x88] sm:$0xff] }
 0x5cc   : > { %2407 = vmatprep.subr.mxu0 %v2370_v28  ;;  %2537 = vmatprep.subr.mxu1 %v2509_v63  ;;  %v3223_v16 = vld [vmem:[#allocation4 + $0x1] ss:$0 sm:$0xff]  ;;  %v2654_v59 = vld [vmem:[#allocation21 + $0xb8] sm:$0xff] }
 0x5cd   : > { %2408 = vmatpush1.msra.mxu0 %v2369_v29  ;;  %2538 = vmatpush1.msra.mxu1 %v2508_v0  ;;  %v2651_v60 = vld [vmem:[#allocation21 + $0xa0] sm:$0xff]  ;;  %v2650_v63 = vld [vmem:[#allocation21 + $0x98] sm:$0xff] }
 0x5ce   : > { %2409 = vmatprep.subr.mxu0 %v2368_v30  ;;  %2539 = vmatprep.subr.mxu1 %v2507_v1  ;;  %v2647_v0 = vld [vmem:[#allocation21 + $0x80] sm:$0xff]  ;;  %v2649_v1 = vld [vmem:[#allocation21 + $0x90] sm:$0xff] }
 0x5cf   : > { %2410 = vmatpush1.msra.mxu0 %v2367_v31  ;;  %2540 = vmatpush1.msra.mxu1 %v2506_v2  ;;  %v2644_v2 = vld [vmem:[#allocation21 + $0x68] sm:$0xff] }
 0x5d0   : > { %2411 = vmatprep.subr.mxu0 %v2366_v32  ;;  %2541 = vmatprep.subr.mxu1 %v2505_v3  ;;  %v2646_v3 = vld [vmem:[#allocation21 + $0x78] sm:$0xff] }
 0x5d1   : > { %2412 = vmatpush1.msra.mxu0 %v2365_v33  ;;  %2542 = vmatpush1.msra.mxu1 %v2504_v4  ;;  %v2643_v4 = vld [vmem:[#allocation21 + $0x60] sm:$0xff] }
 0x5d2   : > { %2413 = vmatprep.subr.mxu0 %v2364_v35  ;;  %2543 = vmatprep.subr.mxu1 %v2503_v5  ;;  %v2645_v5 = vld [vmem:[#allocation21 + $0x70] sm:$0xff] }
 0x5d3   : > { %2414 = vmatpush1.msra.mxu0 %v2363_v36  ;;  %2544 = vmatpush1.msra.mxu1 %v2502_v6  ;;  %v2640_v6 = vld [vmem:[#allocation21 + $0x48] sm:$0xff] }
 0x5d4   : > { %2545 = vmatprep.subr.mxu1 %v2501_v7  ;;  %v2642_v7 = vld [vmem:[#allocation21 + $0x58] sm:$0xff] }
 0x5d5   : > { %2546 = vmatpush1.msra.mxu1 %v2500_v8  ;;  %v2639_v8 = vld [vmem:[#allocation21 + $0x40] sm:$0xff] }
 0x5d6   : > { %2547 = vmatprep.subr.mxu1 %v2499_v9  ;;  %v2641_v9 = vld [vmem:[#allocation21 + $0x50] sm:$0xff] }
 0x5d7   : > { %2548 = vmatpush1.msra.mxu1 %v2498_v10  ;;  %v2636_v10 = vld [vmem:[#allocation21 + $0x28] sm:$0xff] }
 0x63c   : > { %v4740_v37 = vpop.permute.xlu0 %2331  ;;  %v4750_v43 = vpop.permute.xlu1 %2326 }
 0x63d   : > { %v2334_v39 = vmul.f32 %v4740_v37, %v2318_v34  ;;  %v2329_v45 = vmul.f32 %v4750_v43, %v2318_v34 }
 0x63f   : > { %2336 = vrot.lane.b32.xlu1 %v2334_v39, %s4192_s22 }
 0x641   : > { %v4746_v41 = vpop.permute.xlu0 %2347  ;;  %v4752_v44 = vpop.permute.xlu1 %2341 }
 0x642   : > { %v2350_v42 = vmul.f32 %v4746_v41, %v2319_v40  ;;  %v2344_v48 = vmul.f32 %v4752_v44, %v2319_v40 }
 0x644   : > { %2352 = vrot.lane.b32.xlu0 %v2350_v42, %s4192_s22 }
 0x6b1   : > { %v2337_v46 = vpop.permute.xlu1 %2336 }
 0x6b2   : > { %v2339_v47 = vadd.f32 %v2337_v46, %v2329_v45 }
 0x6b4   : > { %v2345_v49 = vadd.f32 %v2344_v48, %v2339_v47 }
 0x6b6   : > { %v2353_v51 = vpop.permute.xlu0 %2352 }
 0x6b7   : > { %v2355_v52 = vadd.f32 %v2353_v51, %v2345_v49  ;;  %v2660_v51 = vld [vmem:[#allocation21 + $0xe8] sm:$0xff] }
 0x6b8   : > { %2682 = vmatprep.subr.mxu0 %v2660_v51 }
 0x6b9   : > { %v2361_v53 = vadd.f32 %v3221_v50, %v2355_v52  ;;  %v2662_v52 = vld [vmem:[#allocation21 + $0xf8] sm:$0xff] }
 0x6ba   : > { %2753 = vmatprep.subr.mxu1 %v2662_v52 }
 0x6bb   : > { %v2362_v54 = vmax.f32 %v2361_v53, 0.0  ;;  %v2659_v53 = vld [vmem:[#allocation21 + $0xe0] sm:$0xff] }
 0x6bd   : > { %3222 = vmatmul.mubr.msk.f32.vlgmr.msra.gmra.mxu0 %vm2379_vm5, %v2362_v54  ;;  %v2656_v54 = vld [vmem:[#allocation21 + $0xc8] sm:$0xff] }
 0x6be   : > { %2730 = vmatprep.mubr.f32.mxu0 %v4191_v38  ;;  %2683 = vmatpush1.msra.mxu0 %v2659_v53 }
 0x6bf   : > { %2684 = vmatprep.subr.mxu0 %v2656_v54 }
 0x77d   : > { %v2449_v55 = vpop.f32.mrf.mxu0 }
 0x77e   : > { %v2455_v56 = vmul.f32 %v2449_v55, %v4740_v37  ;;  %v2454_v11 = vmul.f32 %v2449_v55, %v4750_v43  ;;  %v2658_v55 = vld [vmem:[#allocation21 + $0xd8] sm:$0xff] }
 0x77f   : > { %v2451_v57 = vpop.f32.mrf.mxu0 }
 0x780   : > { %v2463_v58 = vmul.f32 %v2451_v57, %v4746_v41  ;;  %2457 = vrot.lane.b32.xlu1 %v2455_v56, %s4192_s22  ;;  %v2461_v13 = vmul.f32 %v2451_v57, %v4752_v44  ;;  %v2655_v56 = vld [vmem:[#allocation21 + $0xc0] sm:$0xff]  ;;  %v2657_v57 = vld [vmem:[#allocation21 + $0xd0] sm:$0xff] }
 0x781   : > { %2685 = vmatpush1.msra.mxu0 %v2655_v56 }
 0x782   : > { %2465 = vrot.lane.b32.xlu0 %v2463_v58, %s4192_s22  ;;  %v2652_v58 = vld [vmem:[#allocation21 + $0xa8] sm:$0xff] }
 0x783   : > { %2686 = vmatprep.subr.mxu0 %v2652_v58 }
 0x784   : > { %2687 = vmatpush1.msra.mxu0 %v2651_v60 }
 0x785   : > { %2688 = vmatprep.subr.mxu0 %v2648_v62 }
 0x786   : > { %2689 = vmatpush1.msra.mxu0 %v2647_v0 }
 0x787   : > { %2690 = vmatprep.subr.mxu0 %v2644_v2 }
 0x788   : > { %2691 = vmatpush1.msra.mxu0 %v2643_v4 }
 0x789   : > { %2692 = vmatprep.subr.mxu0 %v2640_v6 }
 0x78a   : > { %2693 = vmatpush1.msra.mxu0 %v2639_v8 }
 0x78b   : > { %2694 = vmatprep.subr.mxu0 %v2636_v10 }
 0x7f2   : > { %v2458_v12 = vpop.permute.xlu1 %2457 }
 0x7f3   : > { %v2460_v14 = vadd.f32 %v2458_v12, %v2454_v11  ;;  %v2638_v11 = vld [vmem:[#allocation21 + $0x38] sm:$0xff]  ;;  %v2635_v12 = vld [vmem:[#allocation21 + $0x20] sm:$0xff] }
 0x7f4   : > { %v2466_v17 = vpop.permute.xlu0 %2465  ;;  %2695 = vmatpush1.msra.mxu0 %v2635_v12 }
 0x7f5   : > { %v2462_v15 = vadd.f32 %v2461_v13, %v2460_v14  ;;  %v2637_v13 = vld [vmem:[#allocation21 + $0x30] sm:$0xff]  ;;  %v2632_v14 = vld [vmem:[#allocation21 + $0x8] sm:$0xff] }
 0x7f6   : > { %2696 = vmatprep.subr.mxu0 %v2632_v14 }
 0x7f7   : > { %v2468_v18 = vadd.f32 %v2466_v17, %v2462_v15  ;;  %v2634_v15 = vld [vmem:[#allocation21 + $0x18] sm:$0xff]  ;;  %v2633_v17 = vld [vmem:[#allocation21 + $0x10] sm:$0xff] }
 0x7f9   : > { %v2474_v19 = vadd.f32 %v3223_v16, %v2468_v18  ;;  %v2631_v16 = vld [vmem:[#allocation21] sm:$0xff] }
 0x7fa   : > { %2697 = vmatpush1.msra.mxu0 %v2631_v16 }
 0x7fb   : > { %v2475_v20 = vsel %vm2379_vm5, %v2474_v19, 0.0 }
 0x7fc   : > { %v2476_v21 = vrot.slane %v2475_v20, 4 }
 0x7fe   : > { %v2477_v22 = vadd.f32 %v2476_v21, %v2475_v20 }
 0x800   : > { %v2478_v23 = vrot.slane %v2477_v22, 2 }
 0x802   : > { %v2479_v24 = vadd.f32 %v2478_v23, %v2477_v22  ;;  %v3225_v23 = vld [vmem:[#allocation4 + $0x2] ss:$0 sm:$0xff] }
 0x804   : > { %v2480_v25 = vrot.slane %v2479_v24, 1 }
 0x806   : > { %v2481_v26 = vadd.f32 %v2480_v25, %v2479_v24 }
 0x808   : > { %v2483_v27 = vmul.f32 0.125, %v2481_v26 }
 0x80a   : > { %v2484_v28 = vsub.f32 %v2474_v19, %v2483_v27 }
 0x80c   : > { %v2485_v29 = vmul.f32 %v2484_v28, %v2484_v28 }
 0x80e   : > { %v2486_v30 = vsel %vm2379_vm5, %v2485_v29, 0.0 }
 0x80f   : > { %v2487_v31 = vrot.slane %v2486_v30, 4 }
 0x811   : > { %v2488_v32 = vadd.f32 %v2487_v31, %v2486_v30 }
 0x813   : > { %v2489_v33 = vrot.slane %v2488_v32, 2 }
 0x815   : > { %v2490_v34 = vadd.f32 %v2489_v33, %v2488_v32 }
 0x817   : > { %v2491_v35 = vrot.slane %v2490_v34, 1 }
 0x819   : > { %v2492_v36 = vadd.f32 %v2491_v35, %v2490_v34 }
 0x81b   : > { %v2493_v39 = vmul.f32 0.125, %v2492_v36 }
 0x81d   : > { %v2494_v40 = vadd.f32 1e-05, %v2493_v39 }
 0x81f   : > { %3749 = vrsqrt.f32 %v2494_v40 }
 0x82c   : > { %v3750_v42 = vpop.eup %3749 }
 0x82d   : > { %v2496_v45 = vmul.f32 %v3750_v42, %v2484_v28 }
 0x82f   : > { %v2497_v46 = vmax.f32 %v2496_v45, 0.0 }
 0x831   : > { %3224 = vmatmul.mubr.msk.f32.vlgmr.msra.gmra.mxu1 %vm2379_vm5, %v2497_v46 }
 0x832   : > { %2801 = vmatprep.mubr.f32.mxu1 %v4191_v38  ;;  %v2661_v38 = vld [vmem:[#allocation21 + $0xf0] sm:$0xff] }
 0x833   : > { %2754 = vmatpush1.msra.mxu1 %v2661_v38 }
 0x834   : > { %2755 = vmatprep.subr.mxu1 %v2658_v55 }
 0x835   : > { %2756 = vmatpush1.msra.mxu1 %v2657_v57 }
 0x836   : > { %2757 = vmatprep.subr.mxu1 %v2654_v59 }
 0x837   : > { %2758 = vmatpush1.msra.mxu1 %v2653_v61 }
 0x838   : > { %2759 = vmatprep.subr.mxu1 %v2650_v63  ;;  %v3228_v63 = vld [vmem:[#allocation4 + $0x3] ss:$0 sm:$0xff] }
 0x839   : > { %2760 = vmatpush1.msra.mxu1 %v2649_v1 }
 0x83a   : > { %2761 = vmatprep.subr.mxu1 %v2646_v3 }
 0x83b   : > { %2762 = vmatpush1.msra.mxu1 %v2645_v5 }
 0x83c   : > { %2763 = vmatprep.subr.mxu1 %v2642_v7 }
 0x83d   : > { %2764 = vmatpush1.msra.mxu1 %v2641_v9 }
 0x83e   : > { %2765 = vmatprep.subr.mxu1 %v2638_v11 }
 0x83f   : > { %2766 = vmatpush1.msra.mxu1 %v2637_v13 }
 0x840   : > { %2767 = vmatprep.subr.mxu1 %v2634_v15 }
 0x841   : > { %2768 = vmatpush1.msra.mxu1 %v2633_v17 }
 0x8f1   : > { %v4768_v47 = vpop.f32.mrf.mxu1 }
 0x8f2   : > { %v2589_v48 = vmul.f32 %v4768_v47, %v4740_v37  ;;  %v2588_v18 = vmul.f32 %v4768_v47, %v4750_v43 }
 0x8f3   : > { %v4772_v49 = vpop.f32.mrf.mxu1 }
 0x8f4   : > { %v2597_v50 = vmul.f32 %v4772_v49, %v4746_v41  ;;  %2591 = vrot.lane.b32.xlu1 %v2589_v48, %s4192_s22  ;;  %v2595_v20 = vmul.f32 %v4772_v49, %v4752_v44 }
 0x8f6   : > { %2599 = vrot.lane.b32.xlu0 %v2597_v50, %s4192_s22 }
 0x966   : > { %v2592_v19 = vpop.permute.xlu1 %2591 }
 0x967   : > { %v2594_v21 = vadd.f32 %v2592_v19, %v2588_v18 }
 0x968   : > { %v2600_v24 = vpop.permute.xlu0 %2599 }
 0x969   : > { %v2596_v22 = vadd.f32 %v2595_v20, %v2594_v21 }
 0x96b   : > { %v2602_v25 = vadd.f32 %v2600_v24, %v2596_v22 }
 0x96d   : > { %v2608_v26 = vadd.f32 %v3225_v23, %v2602_v25 }
 0x96f   : > { %v2609_v27 = vsel %vm2379_vm5, %v2608_v26, 0.0 }
 0x970   : > { %v2610_v28 = vrot.slane %v2609_v27, 4 }
 0x972   : > { %v2611_v29 = vadd.f32 %v2610_v28, %v2609_v27 }
 0x974   : > { %v2612_v30 = vrot.slane %v2611_v29, 2 }
 0x976   : > { %v2613_v31 = vadd.f32 %v2612_v30, %v2611_v29 }
 0x978   : > { %v2614_v32 = vrot.slane %v2613_v31, 1 }
 0x97a   : > { %v2615_v33 = vadd.f32 %v2614_v32, %v2613_v31 }
 0x97c   : > { %v2616_v34 = vmul.f32 0.125, %v2615_v33 }
 0x97e   : > { %v2617_v35 = vsub.f32 %v2608_v26, %v2616_v34 }
 0x980   : > { %v2618_v36 = vmul.f32 %v2617_v35, %v2617_v35 }
 0x982   : > { %v2619_v39 = vsel %vm2379_vm5, %v2618_v36, 0.0 }
 0x983   : > { %v2620_v40 = vrot.slane %v2619_v39, 4 }
 0x985   : > { %v2621_v42 = vadd.f32 %v2620_v40, %v2619_v39 }
 0x987   : > { %v2622_v45 = vrot.slane %v2621_v42, 2 }
 0x989   : > { %v2623_v46 = vadd.f32 %v2622_v45, %v2621_v42 }
 0x98b   : > { %v2624_v47 = vrot.slane %v2623_v46, 1 }
 0x98d   : > { %v2625_v48 = vadd.f32 %v2624_v47, %v2623_v46 }
 0x98f   : > { %v2626_v49 = vmul.f32 0.125, %v2625_v48 }
 0x991   : > { %v2627_v50 = vadd.f32 1e-05, %v2626_v49 }
 0x993   : > { %3751 = vrsqrt.f32 %v2627_v50 }
 0x9a0   : > { %v3752_v51 = vpop.eup %3751 }
 0x9a1   : > { %v2629_v52 = vmul.f32 %v3752_v51, %v2617_v35 }
 0x9a3   : > { %v2630_v53 = vmax.f32 %v2629_v52, 0.0 }
 0x9a5   : > { %3226 = vmatmul.mubr.msk.f32.vlgmr.msra.gmra.mxu0 %vm2379_vm5, %v2630_v53  ;;  %3227 = vmatmul.mubr.msk.f32.vlgmr.msra.gmra.mxu1 %vm2379_vm5, %v2630_v53 }
 0xa65   : > { %v2732_v38 = vpop.f32.mrf.mxu0  ;;  %v2803_v54 = vpop.f32.mrf.mxu1 }
 0xa66   : > { %v2808_v56 = vmul.f32 %v2732_v38, %v4750_v43  ;;  %v2811_v59 = vmul.f32 %v2803_v54, %v4752_v44 }
 0xa67   : > { %v2734_v55 = vpop.f32.mrf.mxu0  ;;  %v2805_v58 = vpop.f32.mrf.mxu1 }
 0xa68   : > { %v2809_v57 = vmul.f32 %v2734_v55, %v4740_v37  ;;  %v2813_v62 = vmul.f32 %v2805_v58, %v4746_v41 }
 0xa6a   : > { %v2810_v60 = vadd.f32 %v2809_v57, %v2808_v56 }
 0xa6c   : > { %v2812_v61 = vadd.f32 %v2811_v59, %v2810_v60 }
 0xa6e   : > { %v2814_v0 = vadd.f32 %v2813_v62, %v2812_v61 }
 0xa70   : > { %v2820_v1 = vadd.f32 %v3228_v63, %v2814_v0 }
 0xa72   : > { %2821 = vst [vmem:[#allocation24] sm:$0xff] %v2820_v1 }
 0xa73 PF: > { %p3384_p3 = scmp.eq.s32.totalorder %s4290_s19, 1  ;;  %s4193_s17 = smov [#allocation24]  }
 0xa74   : > { %s2829_s20 = sshll.u32 %s4193_s17, 4  ;;  %s2830_s20 = int_to_ptr.vmem [resolvable:$true] %s2829_s20 }
 0xa75   : > { %s4067_s18 = scalar_lea.vmem %s2830_s20, 128  ;;  %p4074_p5 = scmp.lt.s32.totalorder %s2830_s20, %s2830_s20 }
 0xa76   : > { %p4068_p4 = scmp.ne.s32.totalorder %s2830_s20, %s4067_s18  ;;  %p4075_p8 = scmp.lt.s32.totalorder %s4067_s18, %s4067_s18 }
 0xa78   : > { %p4069_p13 = pnand %p4068_p4, %p3384_p3  ;;  %p4076_p10 = por %p4075_p8, %p4074_p5 }
 0xa7a   : > { %p4070_p0 = pneg %p4069_p13 }
 0xa7c   : > { %p4077_p9 = pnand %p4076_p10, %p4070_p0 }
 0xa7e   : > { %4080 = shalt.err (!%p4077_p9)
}
 0xa7f   : > { %s4866_s0 = sld [smem:[#allocation38_spill]] }
 0xa85   : > { %3320 = dma.vmem_to_hbm [thread:$0]  (%p3384_p3), %s2830_s20, 128, %s4866_s0, [#allocation7]  }
 0xa86   : > { %4144 = dma.done.wait (%p3384_p3), [#allocation7], 128  }
 0xa87   : > { %4146 = vsyncadd (%p3384_p3), [#allocation7], 4294967168 }
 0xa88 PF: > { %p28_p11 = scmp.ge.s32.totalorder %s4403_s28, 4   ;;  %s4867_s29 = smov %s4153_s30 }
 0xa89   : > { %s4868_s30 = smov %s4157_s15  ;;  %s4869_s15 = smov %s4414_s24 }
 0xa8a   : > { %s4870_s16 = smov %s4403_s28  ;;  %30 = sbr.rel (!%p28_p11) target bundleno = 13 (0xd), region = 167 }
 0xa8f   :  { %2842 = vsyncpa [#allocation6], 1 }
 0xa90   :  { %2844 = vsyncpa [#allocation6 + $0x1], 1 }
 0xa91   :  { %2845 = vsyncpa [#allocation9], 1 }
 0xa92   :  { %2846 = vsyncpa [#allocation12], 1 }
 0xa93   :  { %2847 = vsyncpa [#allocation17], 1 }
 0xa94   :  { %2848 = vsyncpa [#allocation20], 1 }
 0xa95   :  { %2849 = vsyncpa [#allocation23], 1 }
 0xa96   :  { %2850 = vsyncpa [#allocation7], 1 }
 0xa97   :  { %2852 = vsyncpa [#allocation7 + $0x1], 1 }

</bundles_post_ra>
